<compile_context>
chip_gen: v6e
topology: v6e:2x2x1
jax: 0.10.0
libtpu: 0.0.40
codegen_flags: <defaults>
</compile_context>

<pallas_src>
import functools

import jax
import jax.numpy as jnp
from jax.experimental import pallas as pl
from jax.experimental.pallas import tpu as pltpu


# ---------------------------------------------------------------------------
# In-kernel helpers
# ---------------------------------------------------------------------------

def _gelu_new(y):
    # GPT-2 "gelu_new" (tanh approximation); tanh goes to the EUP.
    return 0.5 * y * (1.0 + jnp.tanh(0.7978845608028654 * (y + 0.044715 * y * y * y)))


def _layernorm(x, g, b, eps):
    mu = jnp.mean(x, axis=-1, keepdims=True)
    xc = x - mu
    var = jnp.mean(xc * xc, axis=-1, keepdims=True)
    return xc * jax.lax.rsqrt(var + eps) * g + b


# ---------------------------------------------------------------------------
# Fused forward kernel (prologue + per-layer body + epilogue)
# ---------------------------------------------------------------------------

def _fused_forward_kernel(
    # --- non-layer inputs (grid-constant index map, DMA'd once) ---
    ts_ref, x_ref,
    p1w1_ref, p1b1_ref, p1w2_ref, p1b2_ref,
    win1_w_ref, win1_b_ref,
    conv_w_ref, conv_b_ref,
    pos_emb_ref,
    wout_w_ref, wout_b_ref,
    # --- per-layer stacked inputs (leading layer axis squeezed by BlockSpec) ---
    pos_w_ref, pos_b_ref,
    ad_w1_ref, ad_b1_ref, ad_w2_ref, ad_b2_ref,
    ln1_g_ref, ln1_b_ref,
    attn_w_ref, attn_b_ref,
    attn_pw_ref, attn_pb_ref,
    ln2_g_ref, ln2_b_ref,
    mlp_fcw_ref, mlp_fcb_ref,
    mlp_pw_ref, mlp_pb_ref,
    # --- output ---
    out_ref,
    # --- VMEM scratch (persists across grid steps) ---
    hid_ref, tproj_ref, mask_ref,
    *, B, S, H, nH, Dh, eps):
    f32 = jnp.float32
    M = B * S
    layer = pl.program_id(0)

    # ------------------- prologue: first grid step only -------------------
    @pl.when(layer == 0)
    def _prologue():
        # proj1: Linear(2T+2 -> T), ReLU, Linear(T -> T//2), ReLU
        h = jnp.dot(ts_ref[...], p1w1_ref[...], preferred_element_type=f32) + p1b1_ref[...]
        h = jnp.maximum(h, 0.0)
        tb = jnp.dot(h, p1w2_ref[...], preferred_element_type=f32) + p1b2_ref[...]
        tb = jnp.maximum(tb, 0.0)                                  # (B, T//2)

        # Broadcast t_proj over the sequence ONCE (hoisted out of the layer loop).
        row = jax.lax.broadcasted_iota(jnp.int32, (M, 1), 0)
        tfull = jnp.zeros((M, tb.shape[1]), f32)
        for b in range(B):
            in_b = (row >= b * S) & (row < (b + 1) * S)
            tfull = jnp.where(in_b, tb[b:b + 1, :], tfull)
        tproj_ref[...] = tfull

        # Additive causal mask, built ONCE (0 where allowed, -1e30 where masked).
        qi = jax.lax.broadcasted_iota(jnp.int32, (S, S), 0)
        ki = jax.lax.broadcasted_iota(jnp.int32, (S, S), 1)
        mask_ref[...] = jnp.where(ki <= qi, 0.0, -1e30).astype(f32)

        # W_in1: Linear(midi -> H)
        x2 = jnp.dot(x_ref[...], win1_w_ref[...], preferred_element_type=f32) + win1_b_ref[...]

        # W_in2: Conv1d(k=3, pad=1) over relu(x2) as ONE (M,3H)@(3H,H) matmul,
        # plus the pre-ReLU residual x2 (matches the PyTorch module).
        rx = jnp.maximum(x2, 0.0)
        zrow = jnp.zeros((1, H), f32)
        rxm_parts, rxp_parts = [], []
        for b in range(B):
            rb = rx[b * S:(b + 1) * S, :]                          # (S, H)
            rxm_parts.append(jnp.concatenate([zrow, rb[:S - 1, :]], axis=0))   # token s-1
            rxp_parts.append(jnp.concatenate([rb[1:, :], zrow], axis=0))       # token s+1
        rxm = jnp.concatenate(rxm_parts, axis=0)                   # (M, H)
        rxp = jnp.concatenate(rxp_parts, axis=0)                   # (M, H)
        conv_in = jnp.concatenate([rxm, rx, rxp], axis=-1)         # (M, 3H)
        emb = (jnp.dot(conv_in, conv_w_ref[...], preferred_element_type=f32)
               + conv_b_ref[...] + x2)

        # wpe position embeddings, tiled over the batch.
        pe_full = jnp.concatenate([pos_emb_ref[...]] * B, axis=0)  # (M, H)
        hid_ref[...] = emb + pe_full

    # --------------------------- per-layer body ----------------------------
    hidden = hid_ref[...]                                          # (M, H)

    # poss[l]: hidden += Linear(T//2 -> H)(t_proj)
    hidden = (hidden
              + jnp.dot(tproj_ref[...], pos_w_ref[...], preferred_element_type=f32)
              + pos_b_ref[...])

    # adapter: Linear -> ReLU -> Linear, + residual
    a = jnp.maximum(
        jnp.dot(hidden, ad_w1_ref[...], preferred_element_type=f32) + ad_b1_ref[...], 0.0)
    hidden = hidden + jnp.dot(a, ad_w2_ref[...], preferred_element_type=f32) + ad_b2_ref[...]

    # --- GPT-2 block (pre-LN, causal MHA, gelu_new MLP); dropout = identity ---
    resid = hidden
    hln = _layernorm(hidden, ln1_g_ref[...], ln1_b_ref[...], eps)
    qkv = jnp.dot(hln, attn_w_ref[...], preferred_element_type=f32) + attn_b_ref[...]  # (M, 3H)
    q = qkv[:, 0 * H:1 * H]
    k = qkv[:, 1 * H:2 * H]
    v = qkv[:, 2 * H:3 * H]

    scale = 1.0 / float(Dh) ** 0.5
    causal_add = mask_ref[...]                                     # (S, S), precomputed

    batch_outs = []
    for b in range(B):
        r0, r1 = b * S, (b + 1) * S
        head_outs = []
        for h in range(nH):
            c0, c1 = h * Dh, (h + 1) * Dh
            qbh = q[r0:r1, c0:c1]                                  # (S, Dh)
            kbh = k[r0:r1, c0:c1]
            vbh = v[r0:r1, c0:c1]
            s = jnp.dot(qbh, kbh.T, preferred_element_type=f32) * scale + causal_add
            m = jnp.max(s, axis=-1, keepdims=True)
            p = jnp.exp(s - m)
            p = p * pl.reciprocal(jnp.sum(p, axis=-1, keepdims=True), approx=True)
            head_outs.append(jnp.dot(p, vbh, preferred_element_type=f32))
        batch_outs.append(jnp.concatenate(head_outs, axis=-1))     # (S, H)
    attn_out = jnp.concatenate(batch_outs, axis=0)                 # (M, H)

    hidden = (resid
              + jnp.dot(attn_out, attn_pw_ref[...], preferred_element_type=f32)
              + attn_pb_ref[...])

    resid = hidden
    hln2 = _layernorm(hidden, ln2_g_ref[...], ln2_b_ref[...], eps)
    mfc = jnp.dot(hln2, mlp_fcw_ref[...], preferred_element_type=f32) + mlp_fcb_ref[...]
    hidden = (resid
              + jnp.dot(_gelu_new(mfc), mlp_pw_ref[...], preferred_element_type=f32)
              + mlp_pb_ref[...])

    hid_ref[...] = hidden

    # ------------------- epilogue: last grid step only ---------------------
    @pl.when(layer == pl.num_programs(0) - 1)
    def _epilogue():
        y = jnp.dot(hidden, wout_w_ref[...], preferred_element_type=f32) + wout_b_ref[...]
        out_ref[...] = pl.reciprocal(1.0 + jnp.exp(-y), approx=True)   # sigmoid


# ---------------------------------------------------------------------------
# Parameter init (deterministic, synthetic; per-layer weights pre-stacked)
# ---------------------------------------------------------------------------

def init_params(key, cfg):
    H, midi, T, L = cfg["hidden"], cfg["midi"], cfg["T"], cfg["n_layers"]
    red = 12
    ad_h = max(1, H // red)
    T2 = T // 2
    keys = iter(jax.random.split(key, 64))

    def nrm(shape, std=0.02):
        return std * jax.random.normal(next(keys), shape, dtype=jnp.float32)

    def clipped(shape, std=0.01):  # AdapterLayer.init_weights semantics
        w = std * jax.random.normal(next(keys), shape, dtype=jnp.float32)
        return jnp.clip(w, -2.0 * std, 2.0 * std)

    return {
        # proj1: Linear(2T+2 -> T), ReLU, Linear(T -> T//2), ReLU
        "proj1_w1": nrm((2 * T + 2, T)), "proj1_b1": nrm((1, T)),
        "proj1_w2": nrm((T, T2)),        "proj1_b2": nrm((1, T2)),
        # W_in1: Linear(midi -> H)
        "W_in1_w": nrm((midi, H)), "W_in1_b": nrm((1, H)),
        # W_in2: Conv1d(H, H, 3, pad=1); taps stacked along K as [w(-1); w(0); w(+1)]
        "W_in2_w": nrm((3 * H, H)), "W_in2_b": nrm((1, H)),
        # W_out: Linear(H -> midi)
        "W_out_w": nrm((H, midi)), "W_out_b": nrm((1, midi)),
        # GPT positional embedding table (wpe)
        "wpe": nrm((cfg["n_positions"], H)),
        # ---- per-layer weights, stacked along a leading layer axis ----
        "pos_w": nrm((L, T2, H)), "pos_b": nrm((L, 1, H)),
        "ad_w1": clipped((L, H, ad_h)), "ad_b1": clipped((L, 1, ad_h)),
        "ad_w2": clipped((L, ad_h, H)), "ad_b2": clipped((L, 1, H)),
        "ln1_g": jnp.ones((L, 1, H), jnp.float32), "ln1_b": jnp.zeros((L, 1, H), jnp.float32),
        "attn_w": nrm((L, H, 3 * H)), "attn_b": nrm((L, 1, 3 * H)),
        "attn_pw": nrm((L, H, H)), "attn_pb": nrm((L, 1, H)),
        "ln2_g": jnp.ones((L, 1, H), jnp.float32), "ln2_b": jnp.zeros((L, 1, H), jnp.float32),
        "mlp_fcw": nrm((L, H, 4 * H)), "mlp_fcb": nrm((L, 1, 4 * H)),
        "mlp_pw": nrm((L, 4 * H, H)), "mlp_pb": nrm((L, 1, H)),
    }


# ---------------------------------------------------------------------------
# Forward pass (ParamGenerator.forward) -- one fused pallas_call
# ---------------------------------------------------------------------------

def param_generator_forward(params, x, t, cfg):
    B, S, midi = x.shape
    H, T, nH, L = cfg["hidden"], cfg["T"], cfg["n_heads"], cfg["n_layers"]
    Dh = H // nH
    T2 = T // 2
    M = B * S

    # t_embedding (tiny elementwise prep, done wrapper-side)
    freq = jnp.arange(T + 1, dtype=jnp.float32) / (T + 1)
    ts = t[:, None] * freq[None, :]
    ts = jnp.concatenate([jnp.sin(ts), jnp.cos(ts)], axis=1)       # (B, 2T+2)

    x_flat = x.reshape(M, midi)
    pos_emb = params["wpe"][:S]                                    # (S, H)

    non_layer_inputs = [
        ts, x_flat,
        params["proj1_w1"], params["proj1_b1"], params["proj1_w2"], params["proj1_b2"],
        params["W_in1_w"], params["W_in1_b"],
        params["W_in2_w"], params["W_in2_b"],
        pos_emb,
        params["W_out_w"], params["W_out_b"],
    ]
    layer_inputs = [
        params["pos_w"], params["pos_b"],
        params["ad_w1"], params["ad_b1"], params["ad_w2"], params["ad_b2"],
        params["ln1_g"], params["ln1_b"],
        params["attn_w"], params["attn_b"],
        params["attn_pw"], params["attn_pb"],
        params["ln2_g"], params["ln2_b"],
        params["mlp_fcw"], params["mlp_fcb"],
        params["mlp_pw"], params["mlp_pb"],
    ]

    in_specs = (
        # grid-constant blocks: DMA'd once, resident across all layer steps
        [pl.BlockSpec(a.shape, lambda l: (0, 0)) for a in non_layer_inputs]
        # per-layer blocks: leading layer axis squeezed, indexed by the grid step
        + [pl.BlockSpec((None,) + a.shape[1:], lambda l: (l, 0, 0)) for a in layer_inputs]
    )

    kernel = functools.partial(
        _fused_forward_kernel, B=B, S=S, H=H, nH=nH, Dh=Dh, eps=1e-5)

    out = pl.pallas_call(
        kernel,
        out_shape=jax.ShapeDtypeStruct((M, midi), jnp.float32),
        grid=(L,),
        in_specs=in_specs,
        out_specs=pl.BlockSpec((M, midi), lambda l: (0, 0)),
        scratch_shapes=[pltpu.VMEM((M, H), jnp.float32),    # resident hidden state
                        pltpu.VMEM((M, T2), jnp.float32),   # hoisted t_proj broadcast
                        pltpu.VMEM((S, S), jnp.float32)],   # precomputed additive causal mask
        compiler_params=pltpu.CompilerParams(
            dimension_semantics=("arbitrary",)),            # layers are sequential
    )(*(non_layer_inputs + layer_inputs))
    return out.reshape(B, S, midi)


# ---------------------------------------------------------------------------
# Main
# ---------------------------------------------------------------------------

if __name__ == "__main__":
    cfg = dict(T=8, midi=16, hidden=32, n_heads=4, n_layers=2, n_positions=64)
    B, S = 2, 8

    key = jax.random.PRNGKey(0)
    kx, kt = jax.random.split(key)
    x = jax.random.normal(kx, (B, S, cfg["midi"]), dtype=jnp.float32)
    t = jax.random.randint(kt, (B,), 0, cfg["T"]).astype(jnp.float32)

    params = init_params(jax.random.PRNGKey(42), cfg)

    fwd = jax.jit(lambda p, xx, tt: param_generator_forward(p, xx, tt, cfg))
    out = fwd(params, x, t)
    out = jax.block_until_ready(out)

    assert out.shape == (B, S, cfg["midi"])
    assert bool(jnp.all(jnp.isfinite(out)))
    print("KERNEL_OK")
</pallas_src>

<mosaic_0001>
module attributes {stable_mosaic.version = 11 : i64} {
  func.func @_fused_forward_kernel(%arg0: i32, %arg1: memref<2x18xf32, #tpu.memory_space<vmem>>, %arg2: memref<16x16xf32, #tpu.memory_space<vmem>>, %arg3: memref<18x8xf32, #tpu.memory_space<vmem>>, %arg4: memref<1x8xf32, #tpu.memory_space<vmem>>, %arg5: memref<8x4xf32, #tpu.memory_space<vmem>>, %arg6: memref<1x4xf32, #tpu.memory_space<vmem>>, %arg7: memref<16x32xf32, #tpu.memory_space<vmem>>, %arg8: memref<1x32xf32, #tpu.memory_space<vmem>>, %arg9: memref<96x32xf32, #tpu.memory_space<vmem>>, %arg10: memref<1x32xf32, #tpu.memory_space<vmem>>, %arg11: memref<8x32xf32, #tpu.memory_space<vmem>>, %arg12: memref<32x16xf32, #tpu.memory_space<vmem>>, %arg13: memref<1x16xf32, #tpu.memory_space<vmem>>, %arg14: memref<1x4x32xf32, #tpu.memory_space<vmem>>, %arg15: memref<1x1x32xf32, #tpu.memory_space<vmem>>, %arg16: memref<1x32x2xf32, #tpu.memory_space<vmem>>, %arg17: memref<1x1x2xf32, #tpu.memory_space<vmem>>, %arg18: memref<1x2x32xf32, #tpu.memory_space<vmem>>, %arg19: memref<1x1x32xf32, #tpu.memory_space<vmem>>, %arg20: memref<1x1x32xf32, #tpu.memory_space<vmem>>, %arg21: memref<1x1x32xf32, #tpu.memory_space<vmem>>, %arg22: memref<1x32x96xf32, #tpu.memory_space<vmem>>, %arg23: memref<1x1x96xf32, #tpu.memory_space<vmem>>, %arg24: memref<1x32x32xf32, #tpu.memory_space<vmem>>, %arg25: memref<1x1x32xf32, #tpu.memory_space<vmem>>, %arg26: memref<1x1x32xf32, #tpu.memory_space<vmem>>, %arg27: memref<1x1x32xf32, #tpu.memory_space<vmem>>, %arg28: memref<1x32x128xf32, #tpu.memory_space<vmem>>, %arg29: memref<1x1x128xf32, #tpu.memory_space<vmem>>, %arg30: memref<1x128x32xf32, #tpu.memory_space<vmem>>, %arg31: memref<1x1x32xf32, #tpu.memory_space<vmem>>, %arg32: memref<16x16xf32, #tpu.memory_space<vmem>>, %arg33: memref<16x32xf32, #tpu.memory_space<vmem>>, %arg34: memref<16x4xf32, #tpu.memory_space<vmem>>, %arg35: memref<8x8xf32, #tpu.memory_space<vmem>>) attributes {dimension_semantics = [#tpu.dimension_semantics<arbitrary>], iteration_bounds = array<i64: 2>, scalar_prefetch = 0 : i64, scratch_operands = 3 : i64, tpu.core_type = #tpu.core_type<tc>, window_params = [{pipeline_mode = #tpu.pipeline_mode<synchronous>, transform_indices = @transform_0, window_bounds = array<i64: 2, 18>}, {pipeline_mode = #tpu.pipeline_mode<synchronous>, transform_indices = @transform_1, window_bounds = array<i64: 16, 16>}, {pipeline_mode = #tpu.pipeline_mode<synchronous>, transform_indices = @transform_2, window_bounds = array<i64: 18, 8>}, {pipeline_mode = #tpu.pipeline_mode<synchronous>, transform_indices = @transform_3, window_bounds = array<i64: 1, 8>}, {pipeline_mode = #tpu.pipeline_mode<synchronous>, transform_indices = @transform_4, window_bounds = array<i64: 8, 4>}, {pipeline_mode = #tpu.pipeline_mode<synchronous>, transform_indices = @transform_5, window_bounds = array<i64: 1, 4>}, {pipeline_mode = #tpu.pipeline_mode<synchronous>, transform_indices = @transform_6, window_bounds = array<i64: 16, 32>}, {pipeline_mode = #tpu.pipeline_mode<synchronous>, transform_indices = @transform_7, window_bounds = array<i64: 1, 32>}, {pipeline_mode = #tpu.pipeline_mode<synchronous>, transform_indices = @transform_8, window_bounds = array<i64: 96, 32>}, {pipeline_mode = #tpu.pipeline_mode<synchronous>, transform_indices = @transform_9, window_bounds = array<i64: 1, 32>}, {pipeline_mode = #tpu.pipeline_mode<synchronous>, transform_indices = @transform_10, window_bounds = array<i64: 8, 32>}, {pipeline_mode = #tpu.pipeline_mode<synchronous>, transform_indices = @transform_11, window_bounds = array<i64: 32, 16>}, {pipeline_mode = #tpu.pipeline_mode<synchronous>, transform_indices = @transform_12, window_bounds = array<i64: 1, 16>}, {transform_indices = @transform_13, window_bounds = array<i64: 1, 4, 32>}, {transform_indices = @transform_14, window_bounds = array<i64: 1, 1, 32>}, {transform_indices = @transform_15, window_bounds = array<i64: 1, 32, 2>}, {transform_indices = @transform_16, window_bounds = array<i64: 1, 1, 2>}, {transform_indices = @transform_17, window_bounds = array<i64: 1, 2, 32>}, {transform_indices = @transform_18, window_bounds = array<i64: 1, 1, 32>}, {transform_indices = @transform_19, window_bounds = array<i64: 1, 1, 32>}, {transform_indices = @transform_20, window_bounds = array<i64: 1, 1, 32>}, {transform_indices = @transform_21, window_bounds = array<i64: 1, 32, 96>}, {transform_indices = @transform_22, window_bounds = array<i64: 1, 1, 96>}, {transform_indices = @transform_23, window_bounds = array<i64: 1, 32, 32>}, {transform_indices = @transform_24, window_bounds = array<i64: 1, 1, 32>}, {transform_indices = @transform_25, window_bounds = array<i64: 1, 1, 32>}, {transform_indices = @transform_26, window_bounds = array<i64: 1, 1, 32>}, {transform_indices = @transform_27, window_bounds = array<i64: 1, 32, 128>}, {transform_indices = @transform_28, window_bounds = array<i64: 1, 1, 128>}, {transform_indices = @transform_29, window_bounds = array<i64: 1, 128, 32>}, {transform_indices = @transform_30, window_bounds = array<i64: 1, 1, 32>}, {pipeline_mode = #tpu.pipeline_mode<synchronous>, transform_indices = @transform_31, window_bounds = array<i64: 16, 16>}]} {
    %c0_i32 = arith.constant 0 : i32
    %0 = arith.cmpi eq, %arg0, %c0_i32 : i32
    %1 = arith.extui %0 : i1 to i32
    %c0_i32_0 = arith.constant 0 : i32
    %2 = arith.cmpi ne, %1, %c0_i32_0 : i32
    scf.if %2 {
      %c0_124 = arith.constant 0 : index
      %c0_125 = arith.constant 0 : index
      %284 = vector.load %arg1[%c0_124, %c0_125] : memref<2x18xf32, #tpu.memory_space<vmem>>, vector<2x18xf32>
      %c0_126 = arith.constant 0 : index
      %c0_127 = arith.constant 0 : index
      %285 = vector.load %arg3[%c0_126, %c0_127] : memref<18x8xf32, #tpu.memory_space<vmem>>, vector<18x8xf32>
      %cst_128 = arith.constant dense<0.000000e+00> : vector<2x8xf32>
      %286 = tpu.matmul %284, %285, %cst_128 {dimension_numbers = #tpu.dot_dimension_numbers<[1], [0], [0], [1], [0, 0, 1, 1], [], []>} : vector<2x18xf32>, vector<18x8xf32>, vector<2x8xf32> -> vector<2x8xf32>
      %c0_129 = arith.constant 0 : index
      %c0_130 = arith.constant 0 : index
      %287 = vector.load %arg4[%c0_129, %c0_130] : memref<1x8xf32, #tpu.memory_space<vmem>>, vector<1x8xf32>
      %288 = vector.broadcast %287 : vector<1x8xf32> to vector<2x8xf32>
      %289 = arith.addf %286, %288 : vector<2x8xf32>
      %cst_131 = arith.constant 0.000000e+00 : f32
      %290 = vector.broadcast %cst_131 : f32 to vector<2x8xf32>
      %291 = arith.maximumf %289, %290 : vector<2x8xf32>
      %c0_132 = arith.constant 0 : index
      %c0_133 = arith.constant 0 : index
      %292 = vector.load %arg5[%c0_132, %c0_133] : memref<8x4xf32, #tpu.memory_space<vmem>>, vector<8x4xf32>
      %cst_134 = arith.constant dense<0.000000e+00> : vector<2x4xf32>
      %293 = tpu.matmul %291, %292, %cst_134 {dimension_numbers = #tpu.dot_dimension_numbers<[1], [0], [0], [1], [0, 0, 1, 1], [], []>} : vector<2x8xf32>, vector<8x4xf32>, vector<2x4xf32> -> vector<2x4xf32>
      %c0_135 = arith.constant 0 : index
      %c0_136 = arith.constant 0 : index
      %294 = vector.load %arg6[%c0_135, %c0_136] : memref<1x4xf32, #tpu.memory_space<vmem>>, vector<1x4xf32>
      %295 = vector.broadcast %294 : vector<1x4xf32> to vector<2x4xf32>
      %296 = arith.addf %293, %295 : vector<2x4xf32>
      %cst_137 = arith.constant 0.000000e+00 : f32
      %297 = vector.broadcast %cst_137 : f32 to vector<2x4xf32>
      %298 = arith.maximumf %296, %297 : vector<2x4xf32>
      %299 = tpu.iota {dimensions = array<i32: 0>} : vector<16x1xi32>
      %cst_138 = arith.constant 0.000000e+00 : f32
      %300 = vector.broadcast %cst_138 : f32 to vector<16x4xf32>
      %c0_i32_139 = arith.constant 0 : i32
      %301 = vector.broadcast %c0_i32_139 : i32 to vector<16x1xi32>
      %302 = arith.cmpi sge, %299, %301 : vector<16x1xi32>
      %c8_i32 = arith.constant 8 : i32
      %303 = vector.broadcast %c8_i32 : i32 to vector<16x1xi32>
      %304 = arith.cmpi slt, %299, %303 : vector<16x1xi32>
      %305 = arith.andi %302, %304 : vector<16x1xi1>
      %306 = vector.extract_strided_slice %298 {offsets = [0, 0], sizes = [1, 4], strides = [1, 1]} : vector<2x4xf32> to vector<1x4xf32>
      %307 = vector.shape_cast %305 : vector<16x1xi1> to vector<16x1xi1>
      %308 = vector.broadcast %307 : vector<16x1xi1> to vector<16x4xi1>
      %309 = vector.shape_cast %306 : vector<1x4xf32> to vector<1x4xf32>
      %310 = vector.broadcast %309 : vector<1x4xf32> to vector<16x4xf32>
      %311 = arith.select %308, %310, %300 : vector<16x4xi1>, vector<16x4xf32>
      %c8_i32_140 = arith.constant 8 : i32
      %312 = vector.broadcast %c8_i32_140 : i32 to vector<16x1xi32>
      %313 = arith.cmpi sge, %299, %312 : vector<16x1xi32>
      %c16_i32 = arith.constant 16 : i32
      %314 = vector.broadcast %c16_i32 : i32 to vector<16x1xi32>
      %315 = arith.cmpi slt, %299, %314 : vector<16x1xi32>
      %316 = arith.andi %313, %315 : vector<16x1xi1>
      %317 = vector.extract_strided_slice %298 {offsets = [1, 0], sizes = [1, 4], strides = [1, 1]} : vector<2x4xf32> to vector<1x4xf32>
      %318 = vector.shape_cast %316 : vector<16x1xi1> to vector<16x1xi1>
      %319 = vector.broadcast %318 : vector<16x1xi1> to vector<16x4xi1>
      %320 = vector.shape_cast %317 : vector<1x4xf32> to vector<1x4xf32>
      %321 = vector.broadcast %320 : vector<1x4xf32> to vector<16x4xf32>
      %322 = arith.select %319, %321, %311 : vector<16x4xi1>, vector<16x4xf32>
      %c0_141 = arith.constant 0 : index
      %c0_142 = arith.constant 0 : index
      %323 = vector.load %arg34[%c0_141, %c0_142] : memref<16x4xf32, #tpu.memory_space<vmem>>, vector<16x4xf32>
      tpu.vector_store %arg34[%c0_141, %c0_142], %322 {strides = array<i32>} : memref<16x4xf32, #tpu.memory_space<vmem>>, vector<16x4xf32>,
      %324 = tpu.iota {dimensions = array<i32: 0>} : vector<8x8xi32>
      %325 = tpu.iota {dimensions = array<i32: 1>} : vector<8x8xi32>
      %326 = arith.cmpi sle, %325, %324 : vector<8x8xi32>
      %cst_143 = arith.constant 0.000000e+00 : f32
      %cst_144 = arith.constant -1.000000e+30 : f32
      %327 = vector.broadcast %cst_143 : f32 to vector<8x8xf32>
      %328 = vector.broadcast %cst_144 : f32 to vector<8x8xf32>
      %329 = arith.select %326, %327, %328 : vector<8x8xi1>, vector<8x8xf32>
      %c0_145 = arith.constant 0 : index
      %c0_146 = arith.constant 0 : index
      %330 = vector.load %arg35[%c0_145, %c0_146] : memref<8x8xf32, #tpu.memory_space<vmem>>, vector<8x8xf32>
      tpu.vector_store %arg35[%c0_145, %c0_146], %329 {strides = array<i32>} : memref<8x8xf32, #tpu.memory_space<vmem>>, vector<8x8xf32>,
      %c0_147 = arith.constant 0 : index
      %c0_148 = arith.constant 0 : index
      %331 = vector.load %arg2[%c0_147, %c0_148] : memref<16x16xf32, #tpu.memory_space<vmem>>, vector<16x16xf32>
      %c0_149 = arith.constant 0 : index
      %c0_150 = arith.constant 0 : index
      %332 = vector.load %arg7[%c0_149, %c0_150] : memref<16x32xf32, #tpu.memory_space<vmem>>, vector<16x32xf32>
      %cst_151 = arith.constant dense<0.000000e+00> : vector<16x32xf32>
      %333 = tpu.matmul %331, %332, %cst_151 {dimension_numbers = #tpu.dot_dimension_numbers<[1], [0], [0], [1], [0, 0, 1, 1], [], []>} : vector<16x16xf32>, vector<16x32xf32>, vector<16x32xf32> -> vector<16x32xf32>
      %c0_152 = arith.constant 0 : index
      %c0_153 = arith.constant 0 : index
      %334 = vector.load %arg8[%c0_152, %c0_153] : memref<1x32xf32, #tpu.memory_space<vmem>>, vector<1x32xf32>
      %335 = vector.broadcast %334 : vector<1x32xf32> to vector<16x32xf32>
      %336 = arith.addf %333, %335 : vector<16x32xf32>
      %cst_154 = arith.constant 0.000000e+00 : f32
      %337 = vector.broadcast %cst_154 : f32 to vector<16x32xf32>
      %338 = arith.maximumf %336, %337 : vector<16x32xf32>
      %cst_155 = arith.constant 0.000000e+00 : f32
      %339 = vector.broadcast %cst_155 : f32 to vector<1x32xf32>
      %340 = vector.extract_strided_slice %338 {offsets = [0, 0], sizes = [8, 32], strides = [1, 1]} : vector<16x32xf32> to vector<8x32xf32>
      %341 = vector.extract_strided_slice %340 {offsets = [0, 0], sizes = [7, 32], strides = [1, 1]} : vector<8x32xf32> to vector<7x32xf32>
      %342 = tpu.concatenate %339, %341 in 0 : vector<1x32xf32>, vector<7x32xf32> -> vector<8x32xf32>
      %343 = vector.extract_strided_slice %340 {offsets = [1, 0], sizes = [7, 32], strides = [1, 1]} : vector<8x32xf32> to vector<7x32xf32>
      %344 = tpu.concatenate %343, %339 in 0 : vector<7x32xf32>, vector<1x32xf32> -> vector<8x32xf32>
      %345 = vector.extract_strided_slice %338 {offsets = [8, 0], sizes = [8, 32], strides = [1, 1]} : vector<16x32xf32> to vector<8x32xf32>
      %346 = vector.extract_strided_slice %345 {offsets = [0, 0], sizes = [7, 32], strides = [1, 1]} : vector<8x32xf32> to vector<7x32xf32>
      %347 = tpu.concatenate %339, %346 in 0 : vector<1x32xf32>, vector<7x32xf32> -> vector<8x32xf32>
      %348 = vector.extract_strided_slice %345 {offsets = [1, 0], sizes = [7, 32], strides = [1, 1]} : vector<8x32xf32> to vector<7x32xf32>
      %349 = tpu.concatenate %348, %339 in 0 : vector<7x32xf32>, vector<1x32xf32> -> vector<8x32xf32>
      %350 = tpu.concatenate %342, %347 in 0 : vector<8x32xf32>, vector<8x32xf32> -> vector<16x32xf32>
      %351 = tpu.concatenate %344, %349 in 0 : vector<8x32xf32>, vector<8x32xf32> -> vector<16x32xf32>
      %352 = tpu.concatenate %350, %338, %351 in 1 : vector<16x32xf32>, vector<16x32xf32>, vector<16x32xf32> -> vector<16x96xf32>
      %c0_156 = arith.constant 0 : index
      %c0_157 = arith.constant 0 : index
      %353 = vector.load %arg9[%c0_156, %c0_157] : memref<96x32xf32, #tpu.memory_space<vmem>>, vector<96x32xf32>
      %cst_158 = arith.constant dense<0.000000e+00> : vector<16x32xf32>
      %354 = tpu.matmul %352, %353, %cst_158 {dimension_numbers = #tpu.dot_dimension_numbers<[1], [0], [0], [1], [0, 0, 1, 1], [], []>} : vector<16x96xf32>, vector<96x32xf32>, vector<16x32xf32> -> vector<16x32xf32>
      %c0_159 = arith.constant 0 : index
      %c0_160 = arith.constant 0 : index
      %355 = vector.load %arg10[%c0_159, %c0_160] : memref<1x32xf32, #tpu.memory_space<vmem>>, vector<1x32xf32>
      %356 = vector.broadcast %355 : vector<1x32xf32> to vector<16x32xf32>
      %357 = arith.addf %354, %356 : vector<16x32xf32>
      %358 = arith.addf %357, %336 : vector<16x32xf32>
      %c0_161 = arith.constant 0 : index
      %c0_162 = arith.constant 0 : index
      %359 = vector.load %arg11[%c0_161, %c0_162] : memref<8x32xf32, #tpu.memory_space<vmem>>, vector<8x32xf32>
      %360 = tpu.concatenate %359, %359 in 0 : vector<8x32xf32>, vector<8x32xf32> -> vector<16x32xf32>
      %361 = arith.addf %358, %360 : vector<16x32xf32>
      %c0_163 = arith.constant 0 : index
      %c0_164 = arith.constant 0 : index
      %362 = vector.load %arg33[%c0_163, %c0_164] : memref<16x32xf32, #tpu.memory_space<vmem>>, vector<16x32xf32>
      tpu.vector_store %arg33[%c0_163, %c0_164], %361 {strides = array<i32>} : memref<16x32xf32, #tpu.memory_space<vmem>>, vector<16x32xf32>,
    } else {
    }
    %c0 = arith.constant 0 : index
    %c0_1 = arith.constant 0 : index
    %3 = vector.load %arg33[%c0, %c0_1] : memref<16x32xf32, #tpu.memory_space<vmem>>, vector<16x32xf32>
    %c0_2 = arith.constant 0 : index
    %c0_3 = arith.constant 0 : index
    %4 = vector.load %arg34[%c0_2, %c0_3] : memref<16x4xf32, #tpu.memory_space<vmem>>, vector<16x4xf32>
    %c0_4 = arith.constant 0 : index
    %c0_5 = arith.constant 0 : index
    %c0_6 = arith.constant 0 : index
    %5 = vector.load %arg14[%c0_4, %c0_5, %c0_6] : memref<1x4x32xf32, #tpu.memory_space<vmem>>, vector<1x4x32xf32>
    %6 = vector.shape_cast %5 : vector<1x4x32xf32> to vector<4x32xf32>
    %cst = arith.constant dense<0.000000e+00> : vector<16x32xf32>
    %7 = tpu.matmul %4, %6, %cst {dimension_numbers = #tpu.dot_dimension_numbers<[1], [0], [0], [1], [0, 0, 1, 1], [], []>} : vector<16x4xf32>, vector<4x32xf32>, vector<16x32xf32> -> vector<16x32xf32>
    %8 = arith.addf %3, %7 : vector<16x32xf32>
    %c0_7 = arith.constant 0 : index
    %c0_8 = arith.constant 0 : index
    %c0_9 = arith.constant 0 : index
    %9 = vector.load %arg15[%c0_7, %c0_8, %c0_9] : memref<1x1x32xf32, #tpu.memory_space<vmem>>, vector<1x1x32xf32>
    %10 = vector.shape_cast %9 : vector<1x1x32xf32> to vector<1x32xf32>
    %11 = vector.broadcast %10 : vector<1x32xf32> to vector<16x32xf32>
    %12 = arith.addf %8, %11 : vector<16x32xf32>
    %c0_10 = arith.constant 0 : index
    %c0_11 = arith.constant 0 : index
    %c0_12 = arith.constant 0 : index
    %13 = vector.load %arg16[%c0_10, %c0_11, %c0_12] : memref<1x32x2xf32, #tpu.memory_space<vmem>>, vector<1x32x2xf32>
    %14 = vector.shape_cast %13 : vector<1x32x2xf32> to vector<32x2xf32>
    %cst_13 = arith.constant dense<0.000000e+00> : vector<16x2xf32>
    %15 = tpu.matmul %12, %14, %cst_13 {dimension_numbers = #tpu.dot_dimension_numbers<[1], [0], [0], [1], [0, 0, 1, 1], [], []>} : vector<16x32xf32>, vector<32x2xf32>, vector<16x2xf32> -> vector<16x2xf32>
    %c0_14 = arith.constant 0 : index
    %c0_15 = arith.constant 0 : index
    %c0_16 = arith.constant 0 : index
    %16 = vector.load %arg17[%c0_14, %c0_15, %c0_16] : memref<1x1x2xf32, #tpu.memory_space<vmem>>, vector<1x1x2xf32>
    %17 = vector.shape_cast %16 : vector<1x1x2xf32> to vector<1x2xf32>
    %18 = vector.broadcast %17 : vector<1x2xf32> to vector<16x2xf32>
    %19 = arith.addf %15, %18 : vector<16x2xf32>
    %cst_17 = arith.constant 0.000000e+00 : f32
    %20 = vector.broadcast %cst_17 : f32 to vector<16x2xf32>
    %21 = arith.maximumf %19, %20 : vector<16x2xf32>
    %c0_18 = arith.constant 0 : index
    %c0_19 = arith.constant 0 : index
    %c0_20 = arith.constant 0 : index
    %22 = vector.load %arg18[%c0_18, %c0_19, %c0_20] : memref<1x2x32xf32, #tpu.memory_space<vmem>>, vector<1x2x32xf32>
    %23 = vector.shape_cast %22 : vector<1x2x32xf32> to vector<2x32xf32>
    %cst_21 = arith.constant dense<0.000000e+00> : vector<16x32xf32>
    %24 = tpu.matmul %21, %23, %cst_21 {dimension_numbers = #tpu.dot_dimension_numbers<[1], [0], [0], [1], [0, 0, 1, 1], [], []>} : vector<16x2xf32>, vector<2x32xf32>, vector<16x32xf32> -> vector<16x32xf32>
    %25 = arith.addf %12, %24 : vector<16x32xf32>
    %c0_22 = arith.constant 0 : index
    %c0_23 = arith.constant 0 : index
    %c0_24 = arith.constant 0 : index
    %26 = vector.load %arg19[%c0_22, %c0_23, %c0_24] : memref<1x1x32xf32, #tpu.memory_space<vmem>>, vector<1x1x32xf32>
    %27 = vector.shape_cast %26 : vector<1x1x32xf32> to vector<1x32xf32>
    %28 = vector.broadcast %27 : vector<1x32xf32> to vector<16x32xf32>
    %29 = arith.addf %25, %28 : vector<16x32xf32>
    %c0_25 = arith.constant 0 : index
    %c0_26 = arith.constant 0 : index
    %c0_27 = arith.constant 0 : index
    %30 = vector.load %arg20[%c0_25, %c0_26, %c0_27] : memref<1x1x32xf32, #tpu.memory_space<vmem>>, vector<1x1x32xf32>
    %31 = vector.shape_cast %30 : vector<1x1x32xf32> to vector<1x32xf32>
    %c0_28 = arith.constant 0 : index
    %c0_29 = arith.constant 0 : index
    %c0_30 = arith.constant 0 : index
    %32 = vector.load %arg21[%c0_28, %c0_29, %c0_30] : memref<1x1x32xf32, #tpu.memory_space<vmem>>, vector<1x1x32xf32>
    %33 = vector.shape_cast %32 : vector<1x1x32xf32> to vector<1x32xf32>
    %cst_31 = arith.constant dense<0.000000e+00> : vector<16xf32>
    %34 = vector.multi_reduction <add>, %29, %cst_31 [1] : vector<16x32xf32> to vector<16xf32>
    %35 = vector.shape_cast %34 : vector<16xf32> to vector<16x1xf32>
    %cst_32 = arith.constant 3.200000e+01 : f32
    %36 = vector.broadcast %cst_32 : f32 to vector<16x1xf32>
    %37 = arith.divf %35, %36 : vector<16x1xf32>
    %38 = vector.broadcast %37 : vector<16x1xf32> to vector<16x32xf32>
    %39 = arith.subf %29, %38 : vector<16x32xf32>
    %40 = arith.mulf %39, %39 : vector<16x32xf32>
    %cst_33 = arith.constant dense<0.000000e+00> : vector<16xf32>
    %41 = vector.multi_reduction <add>, %40, %cst_33 [1] : vector<16x32xf32> to vector<16xf32>
    %42 = vector.shape_cast %41 : vector<16xf32> to vector<16x1xf32>
    %cst_34 = arith.constant 3.200000e+01 : f32
    %43 = vector.broadcast %cst_34 : f32 to vector<16x1xf32>
    %44 = arith.divf %42, %43 : vector<16x1xf32>
    %cst_35 = arith.constant 9.99999974E-6 : f32
    %45 = vector.broadcast %cst_35 : f32 to vector<16x1xf32>
    %46 = arith.addf %44, %45 : vector<16x1xf32>
    %47 = math.rsqrt %46 : vector<16x1xf32>
    %48 = vector.broadcast %47 : vector<16x1xf32> to vector<16x32xf32>
    %49 = arith.mulf %39, %48 : vector<16x32xf32>
    %50 = vector.broadcast %31 : vector<1x32xf32> to vector<16x32xf32>
    %51 = arith.mulf %49, %50 : vector<16x32xf32>
    %52 = vector.broadcast %33 : vector<1x32xf32> to vector<16x32xf32>
    %53 = arith.addf %51, %52 : vector<16x32xf32>
    %c0_36 = arith.constant 0 : index
    %c0_37 = arith.constant 0 : index
    %c0_38 = arith.constant 0 : index
    %54 = vector.load %arg22[%c0_36, %c0_37, %c0_38] : memref<1x32x96xf32, #tpu.memory_space<vmem>>, vector<1x32x96xf32>
    %55 = vector.shape_cast %54 : vector<1x32x96xf32> to vector<32x96xf32>
    %cst_39 = arith.constant dense<0.000000e+00> : vector<16x96xf32>
    %56 = tpu.matmul %53, %55, %cst_39 {dimension_numbers = #tpu.dot_dimension_numbers<[1], [0], [0], [1], [0, 0, 1, 1], [], []>} : vector<16x32xf32>, vector<32x96xf32>, vector<16x96xf32> -> vector<16x96xf32>
    %c0_40 = arith.constant 0 : index
    %c0_41 = arith.constant 0 : index
    %c0_42 = arith.constant 0 : index
    %57 = vector.load %arg23[%c0_40, %c0_41, %c0_42] : memref<1x1x96xf32, #tpu.memory_space<vmem>>, vector<1x1x96xf32>
    %58 = vector.shape_cast %57 : vector<1x1x96xf32> to vector<1x96xf32>
    %59 = vector.broadcast %58 : vector<1x96xf32> to vector<16x96xf32>
    %60 = arith.addf %56, %59 : vector<16x96xf32>
    %61 = vector.extract_strided_slice %60 {offsets = [0, 0], sizes = [16, 32], strides = [1, 1]} : vector<16x96xf32> to vector<16x32xf32>
    %62 = vector.extract_strided_slice %60 {offsets = [0, 32], sizes = [16, 32], strides = [1, 1]} : vector<16x96xf32> to vector<16x32xf32>
    %63 = vector.extract_strided_slice %60 {offsets = [0, 64], sizes = [16, 32], strides = [1, 1]} : vector<16x96xf32> to vector<16x32xf32>
    %c0_43 = arith.constant 0 : index
    %c0_44 = arith.constant 0 : index
    %64 = vector.load %arg35[%c0_43, %c0_44] : memref<8x8xf32, #tpu.memory_space<vmem>>, vector<8x8xf32>
    %65 = vector.extract_strided_slice %61 {offsets = [0, 0], sizes = [8, 8], strides = [1, 1]} : vector<16x32xf32> to vector<8x8xf32>
    %66 = vector.extract_strided_slice %62 {offsets = [0, 0], sizes = [8, 8], strides = [1, 1]} : vector<16x32xf32> to vector<8x8xf32>
    %67 = vector.extract_strided_slice %63 {offsets = [0, 0], sizes = [8, 8], strides = [1, 1]} : vector<16x32xf32> to vector<8x8xf32>
    %68 = tpu.transpose %66, [1, 0] : vector<8x8xf32> -> vector<8x8xf32>
    %cst_45 = arith.constant dense<0.000000e+00> : vector<8x8xf32>
    %69 = tpu.matmul %65, %68, %cst_45 {dimension_numbers = #tpu.dot_dimension_numbers<[1], [0], [0], [1], [0, 0, 1, 1], [], []>} : vector<8x8xf32>, vector<8x8xf32>, vector<8x8xf32> -> vector<8x8xf32>
    %cst_46 = arith.constant 0.353553385 : f32
    %70 = vector.broadcast %cst_46 : f32 to vector<8x8xf32>
    %71 = arith.mulf %69, %70 : vector<8x8xf32>
    %72 = arith.addf %71, %64 : vector<8x8xf32>
    %cst_47 = arith.constant dense<0xFF800000> : vector<8xf32>
    %73 = vector.multi_reduction <maximumf>, %72, %cst_47 [1] : vector<8x8xf32> to vector<8xf32>
    %74 = vector.shape_cast %73 : vector<8xf32> to vector<8x1xf32>
    %75 = vector.broadcast %74 : vector<8x1xf32> to vector<8x8xf32>
    %76 = arith.subf %72, %75 : vector<8x8xf32>
    %77 = math.exp %76 : vector<8x8xf32>
    %cst_48 = arith.constant dense<0.000000e+00> : vector<8xf32>
    %78 = vector.multi_reduction <add>, %77, %cst_48 [1] : vector<8x8xf32> to vector<8xf32>
    %79 = vector.shape_cast %78 : vector<8xf32> to vector<8x1xf32>
    %80 = tpu.reciprocal %79 {approx = true} : vector<8x1xf32> -> vector<8x1xf32>
    %81 = vector.broadcast %80 : vector<8x1xf32> to vector<8x8xf32>
    %82 = arith.mulf %77, %81 : vector<8x8xf32>
    %cst_49 = arith.constant dense<0.000000e+00> : vector<8x8xf32>
    %83 = tpu.matmul %82, %67, %cst_49 {dimension_numbers = #tpu.dot_dimension_numbers<[1], [0], [0], [1], [0, 0, 1, 1], [], []>} : vector<8x8xf32>, vector<8x8xf32>, vector<8x8xf32> -> vector<8x8xf32>
    %84 = vector.extract_strided_slice %61 {offsets = [0, 8], sizes = [8, 8], strides = [1, 1]} : vector<16x32xf32> to vector<8x8xf32>
    %85 = vector.extract_strided_slice %62 {offsets = [0, 8], sizes = [8, 8], strides = [1, 1]} : vector<16x32xf32> to vector<8x8xf32>
    %86 = vector.extract_strided_slice %63 {offsets = [0, 8], sizes = [8, 8], strides = [1, 1]} : vector<16x32xf32> to vector<8x8xf32>
    %87 = tpu.transpose %85, [1, 0] : vector<8x8xf32> -> vector<8x8xf32>
    %cst_50 = arith.constant dense<0.000000e+00> : vector<8x8xf32>
    %88 = tpu.matmul %84, %87, %cst_50 {dimension_numbers = #tpu.dot_dimension_numbers<[1], [0], [0], [1], [0, 0, 1, 1], [], []>} : vector<8x8xf32>, vector<8x8xf32>, vector<8x8xf32> -> vector<8x8xf32>
    %cst_51 = arith.constant 0.353553385 : f32
    %89 = vector.broadcast %cst_51 : f32 to vector<8x8xf32>
    %90 = arith.mulf %88, %89 : vector<8x8xf32>
    %91 = arith.addf %90, %64 : vector<8x8xf32>
    %cst_52 = arith.constant dense<0xFF800000> : vector<8xf32>
    %92 = vector.multi_reduction <maximumf>, %91, %cst_52 [1] : vector<8x8xf32> to vector<8xf32>
    %93 = vector.shape_cast %92 : vector<8xf32> to vector<8x1xf32>
    %94 = vector.broadcast %93 : vector<8x1xf32> to vector<8x8xf32>
    %95 = arith.subf %91, %94 : vector<8x8xf32>
    %96 = math.exp %95 : vector<8x8xf32>
    %cst_53 = arith.constant dense<0.000000e+00> : vector<8xf32>
    %97 = vector.multi_reduction <add>, %96, %cst_53 [1] : vector<8x8xf32> to vector<8xf32>
    %98 = vector.shape_cast %97 : vector<8xf32> to vector<8x1xf32>
    %99 = tpu.reciprocal %98 {approx = true} : vector<8x1xf32> -> vector<8x1xf32>
    %100 = vector.broadcast %99 : vector<8x1xf32> to vector<8x8xf32>
    %101 = arith.mulf %96, %100 : vector<8x8xf32>
    %cst_54 = arith.constant dense<0.000000e+00> : vector<8x8xf32>
    %102 = tpu.matmul %101, %86, %cst_54 {dimension_numbers = #tpu.dot_dimension_numbers<[1], [0], [0], [1], [0, 0, 1, 1], [], []>} : vector<8x8xf32>, vector<8x8xf32>, vector<8x8xf32> -> vector<8x8xf32>
    %103 = vector.extract_strided_slice %61 {offsets = [0, 16], sizes = [8, 8], strides = [1, 1]} : vector<16x32xf32> to vector<8x8xf32>
    %104 = vector.extract_strided_slice %62 {offsets = [0, 16], sizes = [8, 8], strides = [1, 1]} : vector<16x32xf32> to vector<8x8xf32>
    %105 = vector.extract_strided_slice %63 {offsets = [0, 16], sizes = [8, 8], strides = [1, 1]} : vector<16x32xf32> to vector<8x8xf32>
    %106 = tpu.transpose %104, [1, 0] : vector<8x8xf32> -> vector<8x8xf32>
    %cst_55 = arith.constant dense<0.000000e+00> : vector<8x8xf32>
    %107 = tpu.matmul %103, %106, %cst_55 {dimension_numbers = #tpu.dot_dimension_numbers<[1], [0], [0], [1], [0, 0, 1, 1], [], []>} : vector<8x8xf32>, vector<8x8xf32>, vector<8x8xf32> -> vector<8x8xf32>
    %cst_56 = arith.constant 0.353553385 : f32
    %108 = vector.broadcast %cst_56 : f32 to vector<8x8xf32>
    %109 = arith.mulf %107, %108 : vector<8x8xf32>
    %110 = arith.addf %109, %64 : vector<8x8xf32>
    %cst_57 = arith.constant dense<0xFF800000> : vector<8xf32>
    %111 = vector.multi_reduction <maximumf>, %110, %cst_57 [1] : vector<8x8xf32> to vector<8xf32>
    %112 = vector.shape_cast %111 : vector<8xf32> to vector<8x1xf32>
    %113 = vector.broadcast %112 : vector<8x1xf32> to vector<8x8xf32>
    %114 = arith.subf %110, %113 : vector<8x8xf32>
    %115 = math.exp %114 : vector<8x8xf32>
    %cst_58 = arith.constant dense<0.000000e+00> : vector<8xf32>
    %116 = vector.multi_reduction <add>, %115, %cst_58 [1] : vector<8x8xf32> to vector<8xf32>
    %117 = vector.shape_cast %116 : vector<8xf32> to vector<8x1xf32>
    %118 = tpu.reciprocal %117 {approx = true} : vector<8x1xf32> -> vector<8x1xf32>
    %119 = vector.broadcast %118 : vector<8x1xf32> to vector<8x8xf32>
    %120 = arith.mulf %115, %119 : vector<8x8xf32>
    %cst_59 = arith.constant dense<0.000000e+00> : vector<8x8xf32>
    %121 = tpu.matmul %120, %105, %cst_59 {dimension_numbers = #tpu.dot_dimension_numbers<[1], [0], [0], [1], [0, 0, 1, 1], [], []>} : vector<8x8xf32>, vector<8x8xf32>, vector<8x8xf32> -> vector<8x8xf32>
    %122 = vector.extract_strided_slice %61 {offsets = [0, 24], sizes = [8, 8], strides = [1, 1]} : vector<16x32xf32> to vector<8x8xf32>
    %123 = vector.extract_strided_slice %62 {offsets = [0, 24], sizes = [8, 8], strides = [1, 1]} : vector<16x32xf32> to vector<8x8xf32>
    %124 = vector.extract_strided_slice %63 {offsets = [0, 24], sizes = [8, 8], strides = [1, 1]} : vector<16x32xf32> to vector<8x8xf32>
    %125 = tpu.transpose %123, [1, 0] : vector<8x8xf32> -> vector<8x8xf32>
    %cst_60 = arith.constant dense<0.000000e+00> : vector<8x8xf32>
    %126 = tpu.matmul %122, %125, %cst_60 {dimension_numbers = #tpu.dot_dimension_numbers<[1], [0], [0], [1], [0, 0, 1, 1], [], []>} : vector<8x8xf32>, vector<8x8xf32>, vector<8x8xf32> -> vector<8x8xf32>
    %cst_61 = arith.constant 0.353553385 : f32
    %127 = vector.broadcast %cst_61 : f32 to vector<8x8xf32>
    %128 = arith.mulf %126, %127 : vector<8x8xf32>
    %129 = arith.addf %128, %64 : vector<8x8xf32>
    %cst_62 = arith.constant dense<0xFF800000> : vector<8xf32>
    %130 = vector.multi_reduction <maximumf>, %129, %cst_62 [1] : vector<8x8xf32> to vector<8xf32>
    %131 = vector.shape_cast %130 : vector<8xf32> to vector<8x1xf32>
    %132 = vector.broadcast %131 : vector<8x1xf32> to vector<8x8xf32>
    %133 = arith.subf %129, %132 : vector<8x8xf32>
    %134 = math.exp %133 : vector<8x8xf32>
    %cst_63 = arith.constant dense<0.000000e+00> : vector<8xf32>
    %135 = vector.multi_reduction <add>, %134, %cst_63 [1] : vector<8x8xf32> to vector<8xf32>
    %136 = vector.shape_cast %135 : vector<8xf32> to vector<8x1xf32>
    %137 = tpu.reciprocal %136 {approx = true} : vector<8x1xf32> -> vector<8x1xf32>
    %138 = vector.broadcast %137 : vector<8x1xf32> to vector<8x8xf32>
    %139 = arith.mulf %134, %138 : vector<8x8xf32>
    %cst_64 = arith.constant dense<0.000000e+00> : vector<8x8xf32>
    %140 = tpu.matmul %139, %124, %cst_64 {dimension_numbers = #tpu.dot_dimension_numbers<[1], [0], [0], [1], [0, 0, 1, 1], [], []>} : vector<8x8xf32>, vector<8x8xf32>, vector<8x8xf32> -> vector<8x8xf32>
    %141 = tpu.concatenate %83, %102, %121, %140 in 1 : vector<8x8xf32>, vector<8x8xf32>, vector<8x8xf32>, vector<8x8xf32> -> vector<8x32xf32>
    %142 = vector.extract_strided_slice %61 {offsets = [8, 0], sizes = [8, 8], strides = [1, 1]} : vector<16x32xf32> to vector<8x8xf32>
    %143 = vector.extract_strided_slice %62 {offsets = [8, 0], sizes = [8, 8], strides = [1, 1]} : vector<16x32xf32> to vector<8x8xf32>
    %144 = vector.extract_strided_slice %63 {offsets = [8, 0], sizes = [8, 8], strides = [1, 1]} : vector<16x32xf32> to vector<8x8xf32>
    %145 = tpu.transpose %143, [1, 0] : vector<8x8xf32> -> vector<8x8xf32>
    %cst_65 = arith.constant dense<0.000000e+00> : vector<8x8xf32>
    %146 = tpu.matmul %142, %145, %cst_65 {dimension_numbers = #tpu.dot_dimension_numbers<[1], [0], [0], [1], [0, 0, 1, 1], [], []>} : vector<8x8xf32>, vector<8x8xf32>, vector<8x8xf32> -> vector<8x8xf32>
    %cst_66 = arith.constant 0.353553385 : f32
    %147 = vector.broadcast %cst_66 : f32 to vector<8x8xf32>
    %148 = arith.mulf %146, %147 : vector<8x8xf32>
    %149 = arith.addf %148, %64 : vector<8x8xf32>
    %cst_67 = arith.constant dense<0xFF800000> : vector<8xf32>
    %150 = vector.multi_reduction <maximumf>, %149, %cst_67 [1] : vector<8x8xf32> to vector<8xf32>
    %151 = vector.shape_cast %150 : vector<8xf32> to vector<8x1xf32>
    %152 = vector.broadcast %151 : vector<8x1xf32> to vector<8x8xf32>
    %153 = arith.subf %149, %152 : vector<8x8xf32>
    %154 = math.exp %153 : vector<8x8xf32>
    %cst_68 = arith.constant dense<0.000000e+00> : vector<8xf32>
    %155 = vector.multi_reduction <add>, %154, %cst_68 [1] : vector<8x8xf32> to vector<8xf32>
    %156 = vector.shape_cast %155 : vector<8xf32> to vector<8x1xf32>
    %157 = tpu.reciprocal %156 {approx = true} : vector<8x1xf32> -> vector<8x1xf32>
    %158 = vector.broadcast %157 : vector<8x1xf32> to vector<8x8xf32>
    %159 = arith.mulf %154, %158 : vector<8x8xf32>
    %cst_69 = arith.constant dense<0.000000e+00> : vector<8x8xf32>
    %160 = tpu.matmul %159, %144, %cst_69 {dimension_numbers = #tpu.dot_dimension_numbers<[1], [0], [0], [1], [0, 0, 1, 1], [], []>} : vector<8x8xf32>, vector<8x8xf32>, vector<8x8xf32> -> vector<8x8xf32>
    %161 = vector.extract_strided_slice %61 {offsets = [8, 8], sizes = [8, 8], strides = [1, 1]} : vector<16x32xf32> to vector<8x8xf32>
    %162 = vector.extract_strided_slice %62 {offsets = [8, 8], sizes = [8, 8], strides = [1, 1]} : vector<16x32xf32> to vector<8x8xf32>
    %163 = vector.extract_strided_slice %63 {offsets = [8, 8], sizes = [8, 8], strides = [1, 1]} : vector<16x32xf32> to vector<8x8xf32>
    %164 = tpu.transpose %162, [1, 0] : vector<8x8xf32> -> vector<8x8xf32>
    %cst_70 = arith.constant dense<0.000000e+00> : vector<8x8xf32>
    %165 = tpu.matmul %161, %164, %cst_70 {dimension_numbers = #tpu.dot_dimension_numbers<[1], [0], [0], [1], [0, 0, 1, 1], [], []>} : vector<8x8xf32>, vector<8x8xf32>, vector<8x8xf32> -> vector<8x8xf32>
    %cst_71 = arith.constant 0.353553385 : f32
    %166 = vector.broadcast %cst_71 : f32 to vector<8x8xf32>
    %167 = arith.mulf %165, %166 : vector<8x8xf32>
    %168 = arith.addf %167, %64 : vector<8x8xf32>
    %cst_72 = arith.constant dense<0xFF800000> : vector<8xf32>
    %169 = vector.multi_reduction <maximumf>, %168, %cst_72 [1] : vector<8x8xf32> to vector<8xf32>
    %170 = vector.shape_cast %169 : vector<8xf32> to vector<8x1xf32>
    %171 = vector.broadcast %170 : vector<8x1xf32> to vector<8x8xf32>
    %172 = arith.subf %168, %171 : vector<8x8xf32>
    %173 = math.exp %172 : vector<8x8xf32>
    %cst_73 = arith.constant dense<0.000000e+00> : vector<8xf32>
    %174 = vector.multi_reduction <add>, %173, %cst_73 [1] : vector<8x8xf32> to vector<8xf32>
    %175 = vector.shape_cast %174 : vector<8xf32> to vector<8x1xf32>
    %176 = tpu.reciprocal %175 {approx = true} : vector<8x1xf32> -> vector<8x1xf32>
    %177 = vector.broadcast %176 : vector<8x1xf32> to vector<8x8xf32>
    %178 = arith.mulf %173, %177 : vector<8x8xf32>
    %cst_74 = arith.constant dense<0.000000e+00> : vector<8x8xf32>
    %179 = tpu.matmul %178, %163, %cst_74 {dimension_numbers = #tpu.dot_dimension_numbers<[1], [0], [0], [1], [0, 0, 1, 1], [], []>} : vector<8x8xf32>, vector<8x8xf32>, vector<8x8xf32> -> vector<8x8xf32>
    %180 = vector.extract_strided_slice %61 {offsets = [8, 16], sizes = [8, 8], strides = [1, 1]} : vector<16x32xf32> to vector<8x8xf32>
    %181 = vector.extract_strided_slice %62 {offsets = [8, 16], sizes = [8, 8], strides = [1, 1]} : vector<16x32xf32> to vector<8x8xf32>
    %182 = vector.extract_strided_slice %63 {offsets = [8, 16], sizes = [8, 8], strides = [1, 1]} : vector<16x32xf32> to vector<8x8xf32>
    %183 = tpu.transpose %181, [1, 0] : vector<8x8xf32> -> vector<8x8xf32>
    %cst_75 = arith.constant dense<0.000000e+00> : vector<8x8xf32>
    %184 = tpu.matmul %180, %183, %cst_75 {dimension_numbers = #tpu.dot_dimension_numbers<[1], [0], [0], [1], [0, 0, 1, 1], [], []>} : vector<8x8xf32>, vector<8x8xf32>, vector<8x8xf32> -> vector<8x8xf32>
    %cst_76 = arith.constant 0.353553385 : f32
    %185 = vector.broadcast %cst_76 : f32 to vector<8x8xf32>
    %186 = arith.mulf %184, %185 : vector<8x8xf32>
    %187 = arith.addf %186, %64 : vector<8x8xf32>
    %cst_77 = arith.constant dense<0xFF800000> : vector<8xf32>
    %188 = vector.multi_reduction <maximumf>, %187, %cst_77 [1] : vector<8x8xf32> to vector<8xf32>
    %189 = vector.shape_cast %188 : vector<8xf32> to vector<8x1xf32>
    %190 = vector.broadcast %189 : vector<8x1xf32> to vector<8x8xf32>
    %191 = arith.subf %187, %190 : vector<8x8xf32>
    %192 = math.exp %191 : vector<8x8xf32>
    %cst_78 = arith.constant dense<0.000000e+00> : vector<8xf32>
    %193 = vector.multi_reduction <add>, %192, %cst_78 [1] : vector<8x8xf32> to vector<8xf32>
    %194 = vector.shape_cast %193 : vector<8xf32> to vector<8x1xf32>
    %195 = tpu.reciprocal %194 {approx = true} : vector<8x1xf32> -> vector<8x1xf32>
    %196 = vector.broadcast %195 : vector<8x1xf32> to vector<8x8xf32>
    %197 = arith.mulf %192, %196 : vector<8x8xf32>
    %cst_79 = arith.constant dense<0.000000e+00> : vector<8x8xf32>
    %198 = tpu.matmul %197, %182, %cst_79 {dimension_numbers = #tpu.dot_dimension_numbers<[1], [0], [0], [1], [0, 0, 1, 1], [], []>} : vector<8x8xf32>, vector<8x8xf32>, vector<8x8xf32> -> vector<8x8xf32>
    %199 = vector.extract_strided_slice %61 {offsets = [8, 24], sizes = [8, 8], strides = [1, 1]} : vector<16x32xf32> to vector<8x8xf32>
    %200 = vector.extract_strided_slice %62 {offsets = [8, 24], sizes = [8, 8], strides = [1, 1]} : vector<16x32xf32> to vector<8x8xf32>
    %201 = vector.extract_strided_slice %63 {offsets = [8, 24], sizes = [8, 8], strides = [1, 1]} : vector<16x32xf32> to vector<8x8xf32>
    %202 = tpu.transpose %200, [1, 0] : vector<8x8xf32> -> vector<8x8xf32>
    %cst_80 = arith.constant dense<0.000000e+00> : vector<8x8xf32>
    %203 = tpu.matmul %199, %202, %cst_80 {dimension_numbers = #tpu.dot_dimension_numbers<[1], [0], [0], [1], [0, 0, 1, 1], [], []>} : vector<8x8xf32>, vector<8x8xf32>, vector<8x8xf32> -> vector<8x8xf32>
    %cst_81 = arith.constant 0.353553385 : f32
    %204 = vector.broadcast %cst_81 : f32 to vector<8x8xf32>
    %205 = arith.mulf %203, %204 : vector<8x8xf32>
    %206 = arith.addf %205, %64 : vector<8x8xf32>
    %cst_82 = arith.constant dense<0xFF800000> : vector<8xf32>
    %207 = vector.multi_reduction <maximumf>, %206, %cst_82 [1] : vector<8x8xf32> to vector<8xf32>
    %208 = vector.shape_cast %207 : vector<8xf32> to vector<8x1xf32>
    %209 = vector.broadcast %208 : vector<8x1xf32> to vector<8x8xf32>
    %210 = arith.subf %206, %209 : vector<8x8xf32>
    %211 = math.exp %210 : vector<8x8xf32>
    %cst_83 = arith.constant dense<0.000000e+00> : vector<8xf32>
    %212 = vector.multi_reduction <add>, %211, %cst_83 [1] : vector<8x8xf32> to vector<8xf32>
    %213 = vector.shape_cast %212 : vector<8xf32> to vector<8x1xf32>
    %214 = tpu.reciprocal %213 {approx = true} : vector<8x1xf32> -> vector<8x1xf32>
    %215 = vector.broadcast %214 : vector<8x1xf32> to vector<8x8xf32>
    %216 = arith.mulf %211, %215 : vector<8x8xf32>
    %cst_84 = arith.constant dense<0.000000e+00> : vector<8x8xf32>
    %217 = tpu.matmul %216, %201, %cst_84 {dimension_numbers = #tpu.dot_dimension_numbers<[1], [0], [0], [1], [0, 0, 1, 1], [], []>} : vector<8x8xf32>, vector<8x8xf32>, vector<8x8xf32> -> vector<8x8xf32>
    %218 = tpu.concatenate %160, %179, %198, %217 in 1 : vector<8x8xf32>, vector<8x8xf32>, vector<8x8xf32>, vector<8x8xf32> -> vector<8x32xf32>
    %219 = tpu.concatenate %141, %218 in 0 : vector<8x32xf32>, vector<8x32xf32> -> vector<16x32xf32>
    %c0_85 = arith.constant 0 : index
    %c0_86 = arith.constant 0 : index
    %c0_87 = arith.constant 0 : index
    %220 = vector.load %arg24[%c0_85, %c0_86, %c0_87] : memref<1x32x32xf32, #tpu.memory_space<vmem>>, vector<1x32x32xf32>
    %221 = vector.shape_cast %220 : vector<1x32x32xf32> to vector<32x32xf32>
    %cst_88 = arith.constant dense<0.000000e+00> : vector<16x32xf32>
    %222 = tpu.matmul %219, %221, %cst_88 {dimension_numbers = #tpu.dot_dimension_numbers<[1], [0], [0], [1], [0, 0, 1, 1], [], []>} : vector<16x32xf32>, vector<32x32xf32>, vector<16x32xf32> -> vector<16x32xf32>
    %223 = arith.addf %29, %222 : vector<16x32xf32>
    %c0_89 = arith.constant 0 : index
    %c0_90 = arith.constant 0 : index
    %c0_91 = arith.constant 0 : index
    %224 = vector.load %arg25[%c0_89, %c0_90, %c0_91] : memref<1x1x32xf32, #tpu.memory_space<vmem>>, vector<1x1x32xf32>
    %225 = vector.shape_cast %224 : vector<1x1x32xf32> to vector<1x32xf32>
    %226 = vector.broadcast %225 : vector<1x32xf32> to vector<16x32xf32>
    %227 = arith.addf %223, %226 : vector<16x32xf32>
    %c0_92 = arith.constant 0 : index
    %c0_93 = arith.constant 0 : index
    %c0_94 = arith.constant 0 : index
    %228 = vector.load %arg26[%c0_92, %c0_93, %c0_94] : memref<1x1x32xf32, #tpu.memory_space<vmem>>, vector<1x1x32xf32>
    %229 = vector.shape_cast %228 : vector<1x1x32xf32> to vector<1x32xf32>
    %c0_95 = arith.constant 0 : index
    %c0_96 = arith.constant 0 : index
    %c0_97 = arith.constant 0 : index
    %230 = vector.load %arg27[%c0_95, %c0_96, %c0_97] : memref<1x1x32xf32, #tpu.memory_space<vmem>>, vector<1x1x32xf32>
    %231 = vector.shape_cast %230 : vector<1x1x32xf32> to vector<1x32xf32>
    %cst_98 = arith.constant dense<0.000000e+00> : vector<16xf32>
    %232 = vector.multi_reduction <add>, %227, %cst_98 [1] : vector<16x32xf32> to vector<16xf32>
    %233 = vector.shape_cast %232 : vector<16xf32> to vector<16x1xf32>
    %cst_99 = arith.constant 3.200000e+01 : f32
    %234 = vector.broadcast %cst_99 : f32 to vector<16x1xf32>
    %235 = arith.divf %233, %234 : vector<16x1xf32>
    %236 = vector.broadcast %235 : vector<16x1xf32> to vector<16x32xf32>
    %237 = arith.subf %227, %236 : vector<16x32xf32>
    %238 = arith.mulf %237, %237 : vector<16x32xf32>
    %cst_100 = arith.constant dense<0.000000e+00> : vector<16xf32>
    %239 = vector.multi_reduction <add>, %238, %cst_100 [1] : vector<16x32xf32> to vector<16xf32>
    %240 = vector.shape_cast %239 : vector<16xf32> to vector<16x1xf32>
    %cst_101 = arith.constant 3.200000e+01 : f32
    %241 = vector.broadcast %cst_101 : f32 to vector<16x1xf32>
    %242 = arith.divf %240, %241 : vector<16x1xf32>
    %cst_102 = arith.constant 9.99999974E-6 : f32
    %243 = vector.broadcast %cst_102 : f32 to vector<16x1xf32>
    %244 = arith.addf %242, %243 : vector<16x1xf32>
    %245 = math.rsqrt %244 : vector<16x1xf32>
    %246 = vector.broadcast %245 : vector<16x1xf32> to vector<16x32xf32>
    %247 = arith.mulf %237, %246 : vector<16x32xf32>
    %248 = vector.broadcast %229 : vector<1x32xf32> to vector<16x32xf32>
    %249 = arith.mulf %247, %248 : vector<16x32xf32>
    %250 = vector.broadcast %231 : vector<1x32xf32> to vector<16x32xf32>
    %251 = arith.addf %249, %250 : vector<16x32xf32>
    %c0_103 = arith.constant 0 : index
    %c0_104 = arith.constant 0 : index
    %c0_105 = arith.constant 0 : index
    %252 = vector.load %arg28[%c0_103, %c0_104, %c0_105] : memref<1x32x128xf32, #tpu.memory_space<vmem>>, vector<1x32x128xf32>
    %253 = vector.shape_cast %252 : vector<1x32x128xf32> to vector<32x128xf32>
    %cst_106 = arith.constant dense<0.000000e+00> : vector<16x128xf32>
    %254 = tpu.matmul %251, %253, %cst_106 {dimension_numbers = #tpu.dot_dimension_numbers<[1], [0], [0], [1], [0, 0, 1, 1], [], []>} : vector<16x32xf32>, vector<32x128xf32>, vector<16x128xf32> -> vector<16x128xf32>
    %c0_107 = arith.constant 0 : index
    %c0_108 = arith.constant 0 : index
    %c0_109 = arith.constant 0 : index
    %255 = vector.load %arg29[%c0_107, %c0_108, %c0_109] : memref<1x1x128xf32, #tpu.memory_space<vmem>>, vector<1x1x128xf32>
    %256 = vector.shape_cast %255 : vector<1x1x128xf32> to vector<1x128xf32>
    %257 = vector.broadcast %256 : vector<1x128xf32> to vector<16x128xf32>
    %258 = arith.addf %254, %257 : vector<16x128xf32>
    %cst_110 = arith.constant 5.000000e-01 : f32
    %259 = vector.broadcast %cst_110 : f32 to vector<16x128xf32>
    %260 = arith.mulf %259, %258 : vector<16x128xf32>
    %cst_111 = arith.constant 4.471500e-02 : f32
    %261 = vector.broadcast %cst_111 : f32 to vector<16x128xf32>
    %262 = arith.mulf %261, %258 : vector<16x128xf32>
    %263 = arith.mulf %262, %258 : vector<16x128xf32>
    %264 = arith.mulf %263, %258 : vector<16x128xf32>
    %265 = arith.addf %258, %264 : vector<16x128xf32>
    %cst_112 = arith.constant 0.797884583 : f32
    %266 = vector.broadcast %cst_112 : f32 to vector<16x128xf32>
    %267 = arith.mulf %266, %265 : vector<16x128xf32>
    %268 = math.tanh %267 : vector<16x128xf32>
    %cst_113 = arith.constant 1.000000e+00 : f32
    %269 = vector.broadcast %cst_113 : f32 to vector<16x128xf32>
    %270 = arith.addf %269, %268 : vector<16x128xf32>
    %271 = arith.mulf %260, %270 : vector<16x128xf32>
    %c0_114 = arith.constant 0 : index
    %c0_115 = arith.constant 0 : index
    %c0_116 = arith.constant 0 : index
    %272 = vector.load %arg30[%c0_114, %c0_115, %c0_116] : memref<1x128x32xf32, #tpu.memory_space<vmem>>, vector<1x128x32xf32>
    %273 = vector.shape_cast %272 : vector<1x128x32xf32> to vector<128x32xf32>
    %cst_117 = arith.constant dense<0.000000e+00> : vector<16x32xf32>
    %274 = tpu.matmul %271, %273, %cst_117 {dimension_numbers = #tpu.dot_dimension_numbers<[1], [0], [0], [1], [0, 0, 1, 1], [], []>} : vector<16x128xf32>, vector<128x32xf32>, vector<16x32xf32> -> vector<16x32xf32>
    %275 = arith.addf %227, %274 : vector<16x32xf32>
    %c0_118 = arith.constant 0 : index
    %c0_119 = arith.constant 0 : index
    %c0_120 = arith.constant 0 : index
    %276 = vector.load %arg31[%c0_118, %c0_119, %c0_120] : memref<1x1x32xf32, #tpu.memory_space<vmem>>, vector<1x1x32xf32>
    %277 = vector.shape_cast %276 : vector<1x1x32xf32> to vector<1x32xf32>
    %278 = vector.broadcast %277 : vector<1x32xf32> to vector<16x32xf32>
    %279 = arith.addf %275, %278 : vector<16x32xf32>
    %c0_121 = arith.constant 0 : index
    %c0_122 = arith.constant 0 : index
    %280 = vector.load %arg33[%c0_121, %c0_122] : memref<16x32xf32, #tpu.memory_space<vmem>>, vector<16x32xf32>
    tpu.vector_store %arg33[%c0_121, %c0_122], %279 {strides = array<i32>} : memref<16x32xf32, #tpu.memory_space<vmem>>, vector<16x32xf32>,
    %c1_i32 = arith.constant 1 : i32
    %281 = arith.cmpi eq, %arg0, %c1_i32 : i32
    %282 = arith.extui %281 : i1 to i32
    %c0_i32_123 = arith.constant 0 : i32
    %283 = arith.cmpi ne, %282, %c0_i32_123 : i32
    scf.if %283 {
      %c0_124 = arith.constant 0 : index
      %c0_125 = arith.constant 0 : index
      %284 = vector.load %arg12[%c0_124, %c0_125] : memref<32x16xf32, #tpu.memory_space<vmem>>, vector<32x16xf32>
      %cst_126 = arith.constant dense<0.000000e+00> : vector<16x16xf32>
      %285 = tpu.matmul %279, %284, %cst_126 {dimension_numbers = #tpu.dot_dimension_numbers<[1], [0], [0], [1], [0, 0, 1, 1], [], []>} : vector<16x32xf32>, vector<32x16xf32>, vector<16x16xf32> -> vector<16x16xf32>
      %c0_127 = arith.constant 0 : index
      %c0_128 = arith.constant 0 : index
      %286 = vector.load %arg13[%c0_127, %c0_128] : memref<1x16xf32, #tpu.memory_space<vmem>>, vector<1x16xf32>
      %287 = vector.broadcast %286 : vector<1x16xf32> to vector<16x16xf32>
      %288 = arith.addf %285, %287 : vector<16x16xf32>
      %cst_129 = arith.constant 0.000000e+00 : f32
      %289 = vector.broadcast %cst_129 : f32 to vector<16x16xf32>
      %290 = arith.subf %289, %288 : vector<16x16xf32>
      %291 = math.exp %290 : vector<16x16xf32>
      %cst_130 = arith.constant 1.000000e+00 : f32
      %292 = vector.broadcast %cst_130 : f32 to vector<16x16xf32>
      %293 = arith.addf %292, %291 : vector<16x16xf32>
      %294 = tpu.reciprocal %293 {approx = true} : vector<16x16xf32> -> vector<16x16xf32>
      %c0_131 = arith.constant 0 : index
      %c0_132 = arith.constant 0 : index
      %295 = vector.load %arg32[%c0_131, %c0_132] : memref<16x16xf32, #tpu.memory_space<vmem>>, vector<16x16xf32>
      tpu.vector_store %arg32[%c0_131, %c0_132], %294 {strides = array<i32>} : memref<16x16xf32, #tpu.memory_space<vmem>>, vector<16x16xf32>,
    } else {
    }
    return
  }
  func.func @transform_0(%arg0: i32) -> (i32, i32) {
    %c0_i32 = arith.constant 0 : i32
    %c0_i32_0 = arith.constant 0 : i32
    %c0_i32_1 = arith.constant 0 : i32
    return %c0_i32, %c0_i32_0 : i32, i32
  }
  func.func @transform_1(%arg0: i32) -> (i32, i32) {
    %c0_i32 = arith.constant 0 : i32
    %c0_i32_0 = arith.constant 0 : i32
    %c0_i32_1 = arith.constant 0 : i32
    return %c0_i32, %c0_i32_0 : i32, i32
  }
  func.func @transform_2(%arg0: i32) -> (i32, i32) {
    %c0_i32 = arith.constant 0 : i32
    %c0_i32_0 = arith.constant 0 : i32
    %c0_i32_1 = arith.constant 0 : i32
    return %c0_i32, %c0_i32_0 : i32, i32
  }
  func.func @transform_3(%arg0: i32) -> (i32, i32) {
    %c0_i32 = arith.constant 0 : i32
    %c0_i32_0 = arith.constant 0 : i32
    %c0_i32_1 = arith.constant 0 : i32
    return %c0_i32, %c0_i32_0 : i32, i32
  }
  func.func @transform_4(%arg0: i32) -> (i32, i32) {
    %c0_i32 = arith.constant 0 : i32
    %c0_i32_0 = arith.constant 0 : i32
    %c0_i32_1 = arith.constant 0 : i32
    return %c0_i32, %c0_i32_0 : i32, i32
  }
  func.func @transform_5(%arg0: i32) -> (i32, i32) {
    %c0_i32 = arith.constant 0 : i32
    %c0_i32_0 = arith.constant 0 : i32
    %c0_i32_1 = arith.constant 0 : i32
    return %c0_i32, %c0_i32_0 : i32, i32
  }
  func.func @transform_6(%arg0: i32) -> (i32, i32) {
    %c0_i32 = arith.constant 0 : i32
    %c0_i32_0 = arith.constant 0 : i32
    %c0_i32_1 = arith.constant 0 : i32
    return %c0_i32, %c0_i32_0 : i32, i32
  }
  func.func @transform_7(%arg0: i32) -> (i32, i32) {
    %c0_i32 = arith.constant 0 : i32
    %c0_i32_0 = arith.constant 0 : i32
    %c0_i32_1 = arith.constant 0 : i32
    return %c0_i32, %c0_i32_0 : i32, i32
  }
  func.func @transform_8(%arg0: i32) -> (i32, i32) {
    %c0_i32 = arith.constant 0 : i32
    %c0_i32_0 = arith.constant 0 : i32
    %c0_i32_1 = arith.constant 0 : i32
    return %c0_i32, %c0_i32_0 : i32, i32
  }
  func.func @transform_9(%arg0: i32) -> (i32, i32) {
    %c0_i32 = arith.constant 0 : i32
    %c0_i32_0 = arith.constant 0 : i32
    %c0_i32_1 = arith.constant 0 : i32
    return %c0_i32, %c0_i32_0 : i32, i32
  }
  func.func @transform_10(%arg0: i32) -> (i32, i32) {
    %c0_i32 = arith.constant 0 : i32
    %c0_i32_0 = arith.constant 0 : i32
    %c0_i32_1 = arith.constant 0 : i32
    return %c0_i32, %c0_i32_0 : i32, i32
  }
  func.func @transform_11(%arg0: i32) -> (i32, i32) {
    %c0_i32 = arith.constant 0 : i32
    %c0_i32_0 = arith.constant 0 : i32
    %c0_i32_1 = arith.constant 0 : i32
    return %c0_i32, %c0_i32_0 : i32, i32
  }
  func.func @transform_12(%arg0: i32) -> (i32, i32) {
    %c0_i32 = arith.constant 0 : i32
    %c0_i32_0 = arith.constant 0 : i32
    %c0_i32_1 = arith.constant 0 : i32
    return %c0_i32, %c0_i32_0 : i32, i32
  }
  func.func @transform_13(%arg0: i32) -> (i32, i32, i32) {
    %c0_i32 = arith.constant 0 : i32
    %c0_i32_0 = arith.constant 0 : i32
    %c0_i32_1 = arith.constant 0 : i32
    return %arg0, %c0_i32, %c0_i32_0 : i32, i32, i32
  }
  func.func @transform_14(%arg0: i32) -> (i32, i32, i32) {
    %c0_i32 = arith.constant 0 : i32
    %c0_i32_0 = arith.constant 0 : i32
    %c0_i32_1 = arith.constant 0 : i32
    return %arg0, %c0_i32, %c0_i32_0 : i32, i32, i32
  }
  func.func @transform_15(%arg0: i32) -> (i32, i32, i32) {
    %c0_i32 = arith.constant 0 : i32
    %c0_i32_0 = arith.constant 0 : i32
    %c0_i32_1 = arith.constant 0 : i32
    return %arg0, %c0_i32, %c0_i32_0 : i32, i32, i32
  }
  func.func @transform_16(%arg0: i32) -> (i32, i32, i32) {
    %c0_i32 = arith.constant 0 : i32
    %c0_i32_0 = arith.constant 0 : i32
    %c0_i32_1 = arith.constant 0 : i32
    return %arg0, %c0_i32, %c0_i32_0 : i32, i32, i32
  }
  func.func @transform_17(%arg0: i32) -> (i32, i32, i32) {
    %c0_i32 = arith.constant 0 : i32
    %c0_i32_0 = arith.constant 0 : i32
    %c0_i32_1 = arith.constant 0 : i32
    return %arg0, %c0_i32, %c0_i32_0 : i32, i32, i32
  }
  func.func @transform_18(%arg0: i32) -> (i32, i32, i32) {
    %c0_i32 = arith.constant 0 : i32
    %c0_i32_0 = arith.constant 0 : i32
    %c0_i32_1 = arith.constant 0 : i32
    return %arg0, %c0_i32, %c0_i32_0 : i32, i32, i32
  }
  func.func @transform_19(%arg0: i32) -> (i32, i32, i32) {
    %c0_i32 = arith.constant 0 : i32
    %c0_i32_0 = arith.constant 0 : i32
    %c0_i32_1 = arith.constant 0 : i32
    return %arg0, %c0_i32, %c0_i32_0 : i32, i32, i32
  }
  func.func @transform_20(%arg0: i32) -> (i32, i32, i32) {
    %c0_i32 = arith.constant 0 : i32
    %c0_i32_0 = arith.constant 0 : i32
    %c0_i32_1 = arith.constant 0 : i32
    return %arg0, %c0_i32, %c0_i32_0 : i32, i32, i32
  }
  func.func @transform_21(%arg0: i32) -> (i32, i32, i32) {
    %c0_i32 = arith.constant 0 : i32
    %c0_i32_0 = arith.constant 0 : i32
    %c0_i32_1 = arith.constant 0 : i32
    return %arg0, %c0_i32, %c0_i32_0 : i32, i32, i32
  }
  func.func @transform_22(%arg0: i32) -> (i32, i32, i32) {
    %c0_i32 = arith.constant 0 : i32
    %c0_i32_0 = arith.constant 0 : i32
    %c0_i32_1 = arith.constant 0 : i32
    return %arg0, %c0_i32, %c0_i32_0 : i32, i32, i32
  }
  func.func @transform_23(%arg0: i32) -> (i32, i32, i32) {
    %c0_i32 = arith.constant 0 : i32
    %c0_i32_0 = arith.constant 0 : i32
    %c0_i32_1 = arith.constant 0 : i32
    return %arg0, %c0_i32, %c0_i32_0 : i32, i32, i32
  }
  func.func @transform_24(%arg0: i32) -> (i32, i32, i32) {
    %c0_i32 = arith.constant 0 : i32
    %c0_i32_0 = arith.constant 0 : i32
    %c0_i32_1 = arith.constant 0 : i32
    return %arg0, %c0_i32, %c0_i32_0 : i32, i32, i32
  }
  func.func @transform_25(%arg0: i32) -> (i32, i32, i32) {
    %c0_i32 = arith.constant 0 : i32
    %c0_i32_0 = arith.constant 0 : i32
    %c0_i32_1 = arith.constant 0 : i32
    return %arg0, %c0_i32, %c0_i32_0 : i32, i32, i32
  }
  func.func @transform_26(%arg0: i32) -> (i32, i32, i32) {
    %c0_i32 = arith.constant 0 : i32
    %c0_i32_0 = arith.constant 0 : i32
    %c0_i32_1 = arith.constant 0 : i32
    return %arg0, %c0_i32, %c0_i32_0 : i32, i32, i32
  }
  func.func @transform_27(%arg0: i32) -> (i32, i32, i32) {
    %c0_i32 = arith.constant 0 : i32
    %c0_i32_0 = arith.constant 0 : i32
    %c0_i32_1 = arith.constant 0 : i32
    return %arg0, %c0_i32, %c0_i32_0 : i32, i32, i32
  }
  func.func @transform_28(%arg0: i32) -> (i32, i32, i32) {
    %c0_i32 = arith.constant 0 : i32
    %c0_i32_0 = arith.constant 0 : i32
    %c0_i32_1 = arith.constant 0 : i32
    return %arg0, %c0_i32, %c0_i32_0 : i32, i32, i32
  }
  func.func @transform_29(%arg0: i32) -> (i32, i32, i32) {
    %c0_i32 = arith.constant 0 : i32
    %c0_i32_0 = arith.constant 0 : i32
    %c0_i32_1 = arith.constant 0 : i32
    return %arg0, %c0_i32, %c0_i32_0 : i32, i32, i32
  }
  func.func @transform_30(%arg0: i32) -> (i32, i32, i32) {
    %c0_i32 = arith.constant 0 : i32
    %c0_i32_0 = arith.constant 0 : i32
    %c0_i32_1 = arith.constant 0 : i32
    return %arg0, %c0_i32, %c0_i32_0 : i32, i32, i32
  }
  func.func @transform_31(%arg0: i32) -> (i32, i32) {
    %c0_i32 = arith.constant 0 : i32
    %c0_i32_0 = arith.constant 0 : i32
    %c0_i32_1 = arith.constant 0 : i32
    return %c0_i32, %c0_i32_0 : i32, i32
  }
}

</mosaic_0001>

<bundles_post_ra>
// kernel: _lambda_.1
= control target key start
LH: loop header
LB: loop body
LE: loop exit
PB: predicated region body
PF: predicated region fallthrough
CT: control target
= control target key end

     0   :  { %s4768_s6 = smov 1   ;;  %s4769_s10 = smov 2   ;;  %s5367_s0 = inlined_call_operand.smem [shape: u32[32], index: -1, kind: input, shape index: {}] }
   0x1   :  { %s4830_s5 = sld [smem:[%s5367_s0]]   ;;  %s4770_s14 = smov 3  }
   0x2   :  { %s4835_s9 = sld [smem:[%s5367_s0 + %s4768_s6]]   ;;  %s4771_s18 = smov 4  }
   0x3   :  { %s4840_s13 = sld [smem:[%s5367_s0 + %s4769_s10]]   ;;  %s4772_s22 = smov 5  }
   0x4   :  { %s4845_s17 = sld [smem:[%s5367_s0 + %s4770_s14]]   ;;  %s4773_s26 = smov 6  }
   0x5   :  { %s4850_s21 = sld [smem:[%s5367_s0 + %s4771_s18]]   ;;  %s4774_s30 = smov 7  }
   0x6   :  { %s4855_s25 = sld [smem:[%s5367_s0 + %s4772_s22]]   ;;  %s4775_s4 = smov 8  }
   0x7   :  { %5377 = sst [smem:[#allocation8_spill]] %s4830_s5  ;;  %s4776_s10 = smov 9  }
   0x8   :  { %5378 = sst [smem:[#allocation9_spill]] %s4835_s9  ;;  %s4777_s15 = smov 10  }
   0x9   :  { %5379 = sst [smem:[#allocation10_spill]] %s4840_s13  ;;  %s4778_s20 = smov 11  }
   0xa   :  { %5380 = sst [smem:[#allocation11_spill]] %s4845_s17  ;;  %s4780_s1 = smov 13  }
   0xb   :  { %5381 = sst [smem:[#allocation12_spill]] %s4850_s21  ;;  %s4781_s7 = smov 14  }
   0xc   :  { %5382 = sst [smem:[#allocation13_spill]] %s4855_s25  ;;  %s4783_s22 = smov 16  }
   0xd   :  { %s4860_s29 = sld [smem:[%s5367_s0 + %s4773_s26]]   ;;  %s4779_s26 = smov 12  }
   0xe   :  { %s4865_s3 = sld [smem:[%s5367_s0 + %s4774_s30]]   ;;  %s4784_s28 = smov 17  }
   0xf   :  { %s4870_s8 = sld [smem:[%s5367_s0 + %s4775_s4]]  }
  0x10   :  { %s4875_s14 = sld [smem:[%s5367_s0 + %s4776_s10]]  }
  0x11   :  { %s4880_s19 = sld [smem:[%s5367_s0 + %s4777_s15]]   ;;  %s4782_s15 = smov 15  }
  0x12   :  { %s4885_s24 = sld [smem:[%s5367_s0 + %s4778_s20]]  }
  0x13   :  { %5383 = sst [smem:[#allocation14_spill]] %s4860_s29 }
  0x14   :  { %5384 = sst [smem:[#allocation15_spill]] %s4865_s3 }
  0x15   :  { %5385 = sst [smem:[#allocation16_spill]] %s4870_s8 }
  0x16   :  { %5386 = sst [smem:[#allocation17_spill]] %s4875_s14 }
  0x17   :  { %5387 = sst [smem:[#allocation18_spill]] %s4880_s19 }
  0x18   :  { %5388 = sst [smem:[#allocation19_spill]] %s4885_s24 }
  0x19   :  { %s4890_s30 = sld [smem:[%s5367_s0 + %s4779_s26]]  }
  0x1a   :  { %s4895_s6 = sld [smem:[%s5367_s0 + %s4780_s1]]  }
  0x1b   :  { %s4900_s12 = sld [smem:[%s5367_s0 + %s4781_s7]]   ;;  %s4785_s7 = smov 18  }
  0x1c   :  { %s4905_s20 = sld [smem:[%s5367_s0 + %s4782_s15]]   ;;  %s4786_s15 = smov 19  }
  0x1d   :  { %s4910_s27 = sld [smem:[%s5367_s0 + %s4783_s22]]   ;;  %s4787_s22 = smov 20  }
  0x1e   :  { %s4915_s4 = sld [smem:[%s5367_s0 + %s4784_s28]]   ;;  %s4788_s28 = smov 21  }
  0x1f   :  { %5389 = sst [smem:[#allocation20_spill]] %s4890_s30 }
  0x20   :  { %5390 = sst [smem:[#allocation21_spill]] %s4895_s6 }
  0x21   :  { %5391 = sst [smem:[#allocation22_spill]] %s4900_s12 }
  0x22   :  { %5392 = sst [smem:[#allocation23_spill]] %s4905_s20 }
  0x23   :  { %5393 = sst [smem:[#allocation24_spill]] %s4910_s27 }
  0x24   :  { %s4920_s30 = sld [smem:[%s5367_s0 + %s4785_s7]]   ;;  %s4789_s7 = smov 22  }
  0x25   :  { %s4925_s24 = sld [smem:[%s5367_s0 + %s4786_s15]]   ;;  %s4790_s15 = smov 23  }
  0x26   :  { %s4930_s19 = sld [smem:[%s5367_s0 + %s4787_s22]]   ;;  %s4791_s22 = smov 24  }
  0x27   :  { %s4935_s14 = sld [smem:[%s5367_s0 + %s4788_s28]]   ;;  %s4792_s28 = smov 25  }
  0x28   :  { %s4940_s3 = sld [smem:[%s5367_s0 + %s4789_s7]]   ;;  %s4793_s7 = smov 26  }
  0x29   :  { %s4945_s25 = sld [smem:[%s5367_s0 + %s4790_s15]]   ;;  %s4794_s15 = smov 27  }
  0x2a   :  { %5394 = sst [smem:[#allocation25_spill]] %s4920_s30 }
  0x2b   :  { %s4950_s8 = sld [smem:[%s5367_s0 + %s4791_s22]]   ;;  %s4795_s22 = smov 28  }
  0x2c   :  { %s4955_s9 = sld [smem:[%s5367_s0 + %s4792_s28]]   ;;  %s4796_s28 = smov 29  }
  0x2d   :  { %s4960_s17 = sld [smem:[%s5367_s0 + %s4793_s7]]   ;;  %s4797_s7 = smov 30  }
  0x2e   :  { %s4965_s29 = sld [smem:[%s5367_s0 + %s4794_s15]]   ;;  %s4798_s15 = smov 31  }
  0x2f   :  { %s4970_s21 = sld [smem:[%s5367_s0 + %s4795_s22]]  }
  0x30   :  { %s4975_s5 = sld [smem:[%s5367_s0 + %s4796_s28]]  }
  0x31   :  { %s4980_s13 = sld [smem:[%s5367_s0 + %s4797_s7]]  }
  0x34   :  { %5395 = sst [smem:[#allocation26_spill]] %s4965_s29 }
  0x35   :  { %s4985_s29 = sld [smem:[%s5367_s0 + %s4798_s15]]  }
  0x3b   :  { %5396 = sst [smem:[#allocation27_spill]] %s4985_s29 }
  0x3c   :  { %68 = vsyncpa [#allocation6], 0  ;;  %s4987_s22 = smov 0  }
  0x3d LB: > { %5397 = sst [smem:[#allocation28_spill]] %s4766_s22  ;;  %s4993_s23 = sadd.s32 4294967295, %s4766_s22   ;;  %s4766_s22 = sphi %s4987_s22, %s74_s22  }
  0x3e   : > { %5398 = sst [smem:[#allocation29_spill]] %s4993_s23  ;;  %p4187_p0 = scmp.ge.s32.totalorder %s4766_s22, 1 }
  0x3f   : > { %p1011_p1 = scmp.lt.s32.totalorder %s4766_s22, 3 }
  0x41   : > { %p1012_p2 = pnand %p4187_p0, %p1011_p1 }
  0x43   : > { %1015 = sbr.rel (%p1012_p2) target bundleno = 4157 (0x103d), region = 144 }
  0x48   : > { %s5400_s6 = sld [smem:[#allocation21_spill]]  ;;  %p1147_p3 = scmp.lt.s32.totalorder %s4993_s23, 1 }
  0x49   : > { %s5401_s20 = sld [smem:[#allocation23_spill]] }
  0x4a   : > { %s4999_s0 = scalar_select %p1147_p3, %s4993_s23, 1 }
  0x4b   : > { %s5404_s1 = sld [smem:[#allocation26_spill]] }
  0x4c   : > { %s4188_s26 = sshll.u32 %s4999_s0, 2  ;;  %s4269_s7 = sshll.u32 %s4999_s0, 5 }
  0x4d   : > { %s4191_s15 = sshll.u32 %s4999_s0, 1  ;;  %s1171_s22 = scalar_lea.vmem %s4925_s24, %s4999_s0 }
  0x4e   : > { %s5005_s2 = scalar_lea.vmem %s5400_s6, %s4188_s26  ;;  %s5017_s18 = scalar_lea.vmem %s4915_s4, %s4191_s15 }
  0x4f   : > { %5405 = sst [smem:[#allocation30_spill]] %s5005_s2  ;;  %s5009_s10 = scalar_lea.vmem %s5401_s20, %s4269_s7 }
  0x50   : > { %5406 = sst [smem:[#allocation31_spill]] %s5009_s10  ;;  %s5024_s28 = scalar_lea.vmem %s4935_s14, %s4269_s7 }
  0x51   : > { %s1182_s26 = scalar_lea.vmem %s4940_s3, %s4999_s0  ;;  %s5029_s6 = scalar_lea.vmem %s4945_s25, %s4269_s7 }
  0x52   : > { %s1193_s2 = scalar_lea.vmem %s4955_s9, %s4999_s0  ;;  %s5038_s20 = scalar_lea.vmem %s5404_s1, %s4269_s7 }
  0x53   : > { %s1204_s10 = scalar_lea.vmem %s4970_s21, %s4999_s0  ;;  %s4273_s11 = sshll.u32 %s4999_s0, 7 }
  0x54   : > { %s5044_s27 = scalar_lea.vmem %s4975_s5, %s4273_s11  ;;  %s5407_s30 = sld [smem:[#allocation29_spill]] }
  0x5a   : > { %p4200_p4 = scmp.ne.s32.totalorder %s5407_s30, 0 }
  0x5b   : > { %s5408_s15 = sld [smem:[#allocation10_spill]] (!%p4200_p4)  ;;  %s4802_s11 = smov (!%p4200_p4), 32  }
  0x5c   : > { %1216 = sbr.rel (%p4200_p4) target bundleno = 829 (0x33d), region = 148  ;;  %s5409_s29 = sld [smem:[#allocation8_spill]] (!%p4200_p4) }
  0x5d   : > { %s5410_s12 = sld [smem:[#allocation12_spill]] (!%p4200_p4) }
  0x5e   : > { %s5411_s23 = sld [smem:[#allocation14_spill]] (!%p4200_p4) }
  0x5f   : > { %s5412_s30 = sld [smem:[#allocation11_spill]] (!%p4200_p4) }
  0x60   : > { %s5413_s1 = sld [smem:[#allocation9_spill]] (!%p4200_p4) }
  0x61   : > { %v1220_v0 = vld [vmem:[%s5408_s15 + $0x10] sm:$0x3]  ;;  %vm1232_vm0 = vcmask 1041408   ;;  %v4799_v1 = vmov 0.0   ;;  %v1219_v2 = vld [vmem:[%s5408_s15 + $0x8] sm:$0xff]  ;;  %vm4800_vm1 = vmmov 0   ;;  %v1390_v7 = vlaneseq }
  0x62   : > { %4384 = vmatprep.subr.mxu1 %v4799_v1  ;;  %4390 = vmatprep.mubr.msk.f32.mxu1 %vm4800_vm1, %v4799_v1  ;;  %v1218_v3 = vld [vmem:[%s5408_s15] sm:$0xff]  ;;  %vm1228_vm2 = vcmask 146432   ;;  %vm1315_vm4 = vcmask 64512   ;;  %v4801_v10 = vmov -1e+30   ;;  %vm1444_vm5 = vcmask 130048  }
  0x63   : > { %4385 = vmatpush3.msk.msra.mxu1 %vm1232_vm0, %v1220_v0  ;;  %v1217_v4 = vld [vmem:[%s5409_s29] sm:$0x3]  ;;  %v5055_v8 = vshrl.u32 %v1390_v7, 7  ;;  %v1429_v9 = vand.u32 127, %v1390_v7  ;;  %s5414_s29 = sld [smem:[#allocation16_spill]]  ;;  %vm1425_vm6 = vcmask 31744  }
  0x64   : > { %4386 = vmatprep.subr.mxu1 %v4799_v1  ;;  %v1307_v5 = vld [vmem:[%s5410_s12] sm:$0xff]  ;;  %v1436_v6 = vld [vmem:[%s5411_s23 + $0x8] sm:$0xff]  ;;  %s5415_s12 = sld [smem:[#allocation13_spill]]  ;;  %vm1535_vm7 = vcmask 1046528   ;;  %vm1558_vm8 = vcmask 261120   ;;  %vm1531_vm9 = vcmask 1040384  }
  0x65   : > { %4387 = vmatpush3.msra.mxu1 %v1219_v2  ;;  %vm1430_vm3 = vcmp.le.s32.totalorder %v1429_v9, %v5055_v8  ;;  %v4201_v12 = vld [vmem:[%s5412_s30] ss:$0 sm:$0xff]  ;;  %s5416_s7 = sld [smem:[#allocation15_spill]]  ;;  %v1405_v33 = vsub.s32 0, %v5055_v8  ;;  %v1421_v34 = vsub.s32 1, %v5055_v8  ;;  %s4803_s30 = smov 64  }
  0x66   : > { %4388 = vmatprep.subr.mxu1 %v4799_v1  ;;  %v1431_v11 = vsel %vm1430_vm3, 0.0, %v4801_v10  ;;  %v1433_v17 = vld [vmem:[%s5413_s1] sm:$0xff]  ;;  %v1434_v19 = vld [vmem:[%s5413_s1 + $0x8] sm:$0xff]  ;;  %vm1561_vm10 = vcmask 523264   ;;  %vm1583_vm11 = vcmask 785408  }
  0x67   : > { %4389 = vmatpush3.msra.mxu1 %v1218_v3  ;;  %1432 = vst.msk [vmem:[#allocation4] sm:$0xff] %vm1315_vm4, %v1431_v11  ;;  %v1435_v18 = vld [vmem:[%s5411_s23] sm:$0xff] }
  0x68   : > { %4391 = vmatmul.mubr.msk.f32.vlgmr.msra.gmra.mxu1 %vm1228_vm2, %v1217_v4  ;;  %4393 = vmatprep.subr.mxu1 %v4799_v1 }
  0x69   : > { %4395 = vmatprep.mubr.msk.f32.mxu1 %vm4800_vm1, %v4799_v1  ;;  %4394 = vmatpush3.msra.mxu1 %v1307_v5  ;;  %v1575_v20 = vld [vmem:[%s5414_s29 + $0x58] sm:$0xff]  ;;  %v1574_v21 = vld [vmem:[%s5414_s29 + $0x50] sm:$0xff]  ;;  %v1573_v22 = vld [vmem:[%s5414_s29 + $0x48] sm:$0xff] }
  0x6a   : > { %4398 = vmatprep.subr.mxu1 %v1436_v6  ;;  %4405 = vmatprep.subr.mxu0 %v1575_v20  ;;  %v1572_v23 = vld [vmem:[%s5414_s29 + $0x40] sm:$0xff]  ;;  %v1571_v24 = vld [vmem:[%s5414_s29 + $0x38] sm:$0xff]  ;;  %v1570_v25 = vld [vmem:[%s5414_s29 + $0x30] sm:$0xff] }
  0x6b   : > { %4406 = vmatpush3.msra.mxu0 %v1575_v20  ;;  %v1569_v26 = vld [vmem:[%s5414_s29 + $0x28] sm:$0xff]  ;;  %v1568_v27 = vld [vmem:[%s5414_s29 + $0x20] sm:$0xff]  ;;  %v1567_v28 = vld [vmem:[%s5414_s29 + $0x18] sm:$0xff] }
  0x6c   : > { %4407 = vmatprep.subr.mxu0 %v1574_v21  ;;  %v4204_v29 = vld [vmem:[%s5415_s12] ss:$0 sm:$0xff]  ;;  %v1566_v30 = vld [vmem:[%s5414_s29 + $0x10] sm:$0xff]  ;;  %v1565_v35 = vld [vmem:[%s5414_s29 + $0x8] sm:$0xff]  ;;  %s5417_s12 = sld [smem:[#allocation17_spill]] }
  0x6d   : > { %4408 = vmatpush3.msra.mxu0 %v1574_v21  ;;  %v4206_v37 = vld [vmem:[%s5416_s7] ss:$0 sm:$0xff]  ;;  %s5418_s7 = sld [smem:[#allocation18_spill]] }
  0x6e   : > { %4409 = vmatprep.subr.mxu0 %v1573_v22  ;;  %v1564_v38 = vld [vmem:[%s5414_s29] sm:$0xff] }
  0x6f   : > { %4410 = vmatpush3.msra.mxu0 %v1573_v22 }
  0x70   : > { %4411 = vmatprep.subr.mxu0 %v1572_v23 }
  0x71   : > { %4412 = vmatpush3.msra.mxu0 %v1572_v23 }
  0x72   : > { %4413 = vmatprep.subr.mxu0 %v1571_v24  ;;  %v4209_v0 = vld [vmem:[%s5417_s12] ss:$0 sm:$0xff] }
  0x73   : > { %4414 = vmatpush3.msra.mxu0 %v1571_v24  ;;  %v1667_v3 = vld [vmem:[%s5418_s7] sm:$0xff] }
  0x74   : > { %4415 = vmatprep.subr.mxu0 %v1570_v25 }
  0x75   : > { %4416 = vmatpush3.msra.mxu0 %v1570_v25 }
  0x76   : > { %4417 = vmatprep.subr.mxu0 %v1569_v26 }
  0x77   : > { %4418 = vmatpush3.msra.mxu0 %v1569_v26 }
  0x78   : > { %4419 = vmatprep.subr.mxu0 %v1568_v27 }
  0x79   : > { %4420 = vmatpush3.msra.mxu0 %v1568_v27 }
  0x7a   : > { %4421 = vmatprep.subr.mxu0 %v1567_v28 }
  0x7b   : > { %4422 = vmatpush3.msra.mxu0 %v1567_v28 }
  0x7c   : > { %4423 = vmatprep.subr.mxu0 %v1566_v30 }
  0x7d   : > { %4424 = vmatpush3.msra.mxu0 %v1566_v30 }
  0x7e   : > { %4425 = vmatprep.subr.mxu0 %v1565_v35 }
  0x7f   : > { %4426 = vmatpush3.msra.mxu0 %v1565_v35 }
  0x80   : > { %4427 = vmatprep.subr.mxu0 %v1564_v38 }
  0x81   : > { %4428 = vmatpush3.msra.mxu0 %v1564_v38 }
 0x128   : > { %v1302_v13 = vpop.f32.mrf.mxu1 }
 0x129   : > { %v1303_v14 = vadd.f32 %v4201_v12, %v1302_v13 }
 0x12a   : > { %v4392_v15 = vpop.f32.mrf.mxu1 }
 0x12b   : > { %v1306_v16 = vmax.f32 %v1303_v14, 0.0 }
 0x12d   : > { %4396 = vmatmul.mubr.msk.f32.vlgmr.msra.gmra.mxu1 %vm1315_vm4, %v1306_v16 }
 0x12e   : > { %4399 = vmatpush3.msra.mxu1 %v1436_v6  ;;  %4402 = vmatprep.mubr.msk.f32.mxu1 %vm1444_vm5, %v1433_v17 }
 0x12f   : > { %4400 = vmatprep.subr.mxu1 %v1435_v18 }
 0x130   : > { %4401 = vmatpush3.msra.mxu1 %v1435_v18 }
 0x131   : > { %4403 = vmatmul.mubr.msk.f32.vlgmr.msra.gmra.mxu1 %vm1444_vm5, %v1434_v19 }
 0x1ed   : > { %v1385_v31 = vpop.f32.mrf.mxu1 }
 0x1ee   : > { %v1386_v32 = vadd.f32 %v4204_v29, %v1385_v31 }
 0x1ef   : > { %v4397_v36 = vpop.f32.mrf.mxu1 }
 0x1f0   : > { %v1389_v39 = vmax.f32 %v1386_v32, 0.0 }
 0x1f1   : > { %v4404_v40 = vpop.f32.mrf.mxu1 }
 0x1f2   : > { %v1406_v41 = vrot.slane %v1389_v39, %v1405_v33  ;;  %v1422_v42 = vrot.slane %v1389_v39, %v1421_v34  ;;  %v1523_v43 = vadd.f32 %v4404_v40, %v4206_v37 }
 0x1f3   : > { %v1517_v44 = vpop.f32.mrf.mxu1 }
 0x1f4   : > { %1426 = vst.msk [vmem:[#allocation3] sm:$0xff] %vm1425_vm6, %v1406_v41  ;;  %1427 = vst.msk [vmem:[#allocation3 + $0x8] sm:$0xff] %vm1425_vm6, %v1422_v42  ;;  %v1518_v45 = vadd.f32 %v4206_v37, %v1517_v44  ;;  %v1527_v46 = vmax.f32 %v1523_v43, 0.0 }
 0x1f6   : > { %v1526_v47 = vmax.f32 %v1518_v45, 0.0  ;;  %v1541_v50 = vrot.slane %v1527_v46, 1  ;;  %v1538_v55 = vrot.slane %v1527_v46, 7 }
 0x1f8   : > { %1544 = vrot.lane.b32.xlu0 %v1526_v47, %s4802_s11  ;;  %v1533_v48 = vrot.slane %v1526_v47, 1  ;;  %v1543_v51 = vsel %vm1535_vm7, %v1541_v50, 0.0  ;;  %v1529_v52 = vrot.slane %v1526_v47, 7  ;;  %v1540_v60 = vsel %vm1531_vm9, 0.0, %v1538_v55 }
 0x1fa   : > { %v1536_v49 = vsel %vm1535_vm7, %v1533_v48, 0.0  ;;  %v1532_v54 = vsel %vm1531_vm9, 0.0, %v1529_v52 }
 0x1fb   : > { %1552 = vrot.lane.b32.xlu1 %v1536_v49, %s4803_s30 }
 0x1fc   : > { %1546 = vrot.lane.b32.xlu0 %v1527_v46, %s4802_s11 }
 0x1ff   : > { %1554 = vrot.lane.b32.xlu1 %v1543_v51, %s4803_s30 }
 0x26a   : > { %v1545_v53 = vpop.permute.xlu0 %1544 }
 0x26b   : > { %v1559_v56 = vsel %vm1558_vm8, %v1532_v54, %v1545_v53 }
 0x26d   : > { %v1553_v57 = vpop.permute.xlu1 %1552 }
 0x26e   : > { %v1547_v58 = vpop.permute.xlu0 %1546  ;;  %v1562_v59 = vsel %vm1561_vm10, %v1559_v56, %v1553_v57 }
 0x26f   : > { %4429 = vmatprep.mubr.msk.f32.mxu0 %vm1583_vm11, %v1562_v59  ;;  %v1560_v61 = vsel %vm1558_vm8, %v1540_v60, %v1547_v58 }
 0x271   : > { %v1555_v62 = vpop.permute.xlu1 %1554 }
 0x272   : > { %v1563_v63 = vsel %vm1561_vm10, %v1560_v61, %v1555_v62 }
 0x273   : > { %4430 = vmatmul.mubr.msk.f32.vlgmr.msra.gmra.mxu0 %vm1583_vm11, %v1563_v63 }
 0x333   : > { %v4431_v1 = vpop.f32.mrf.mxu0 }
 0x334   : > { %v1662_v2 = vadd.f32 %v4431_v1, %v4209_v0 }
 0x335   : > { %v1656_v4 = vpop.f32.mrf.mxu0 }
 0x336   : > { %v1666_v5 = vadd.f32 %v1662_v2, %v1523_v43  ;;  %v1657_v6 = vadd.f32 %v4209_v0, %v1656_v4 }
 0x338   : > { %v1669_v7 = vadd.f32 %v1667_v3, %v1666_v5  ;;  %v1665_v8 = vadd.f32 %v1657_v6, %v1518_v45 }
 0x33a   : > { %1671 = vst.msk [vmem:[#allocation2 + $0x8] sm:$0xff] %vm1558_vm8, %v1669_v7  ;;  %v1668_v9 = vadd.f32 %v1667_v3, %v1665_v8 }
 0x33c   : > { %1670 = vst.msk [vmem:[#allocation2] sm:$0xff] %vm1558_vm8, %v1668_v9 }
 0x33d PF: > { %s5419_s11 = sld [smem:[#allocation30_spill]]  ;;  %vm1684_vm12 = vcmask 1043456   ;;  %v1674_v11 = vld [vmem:[#allocation3] sm:$0xff]  ;;  %vm1677_vm13 = vcmask 31744   ;;  %v1675_v12 = vld [vmem:[#allocation3 + $0x8] sm:$0xff]  ;;  %vm1785_vm14 = vcmask 261120  }
 0x33e   : > { %s5420_s30 = sld [smem:[#allocation31_spill]]  ;;  %4434 = vmatprep.mubr.msk.f32.mxu0 %vm1677_vm13, %v1674_v11  ;;  %v1869_v26 = vld [vmem:[%s5017_s18] sm:$0x3]  ;;  %vm1877_vm15 = vcmask 1041408   ;;  %vm1870_vm0 = vcmask 15360   ;;  %v2015_v53 = vld [vmem:[%s5024_s28 + $0x18] sm:$0xff] }
 0x33f   : > { %s5421_s12 = sld [smem:[#allocation22_spill]]  ;;  %v2014_v54 = vld [vmem:[%s5024_s28 + $0x10] sm:$0xff]  ;;  %v2013_v55 = vld [vmem:[%s5024_s28 + $0x8] sm:$0xff]  ;;  %v2012_v56 = vld [vmem:[%s5024_s28] sm:$0xff]  ;;  %v4804_v9 = vmov 0.0   ;;  %vm4805_vm1 = vmmov 0  }
 0x340   : > { %s5422_s7 = sld [smem:[#allocation24_spill]]  ;;  %v4223_v0 = vld [vmem:[%s1171_s22] ss:$0 sm:$0xff]  ;;  %s4806_s22 = smov 88   ;;  %vm2108_vm2 = vcmask 64512   ;;  %vm2786_vm3 = vcmask 130048  }
 0x341   : > { %v1673_v17 = vld [vmem:[#allocation2 + $0x8] sm:$0xff]  ;;  %v4225_v11 = vld [vmem:[%s1182_s26] ss:$0 sm:$0xff]  ;;  %s4807_s28 = smov 96   ;;  %s4812_s26 = smov 72   ;;  %vm2788_vm4 = vcmask 195584  }
 0x343   : > { %v1676_v10 = vld [vmem:[%s5419_s11] sm:$0xf] }
 0x344   : > { %4432 = vmatprep.subr.msk.mxu0 %vm1684_vm12, %v1676_v10  ;;  %v1777_v13 = vld [vmem:[%s5420_s30 + $0x18] sm:$0xff]  ;;  %v1776_v14 = vld [vmem:[%s5420_s30 + $0x10] sm:$0xff]  ;;  %v1775_v15 = vld [vmem:[%s5420_s30 + $0x8] sm:$0xff] }
 0x345   : > { %4433 = vmatpush3.msk.msra.mxu0 %vm1684_vm12, %v1676_v10  ;;  %4437 = vmatprep.subr.mxu1 %v1777_v13  ;;  %v1774_v16 = vld [vmem:[%s5420_s30] sm:$0xff]  ;;  %s5423_s11 = scalar_lea.vmem %s5421_s12, %s4999_s0  ;;  %s5424_s30 = sld [smem:[#allocation25_spill]] }
 0x346   : > { %4435 = vmatmul.mubr.msk.f32.vlgmr.msra.gmra.mxu0 %vm1677_vm13, %v1675_v12  ;;  %4438 = vmatpush3.msra.mxu1 %v1777_v13  ;;  %v1672_v19 = vld [vmem:[#allocation2] sm:$0xff]  ;;  %s5425_s16 = scalar_lea.vmem %s5422_s7, %s4999_s0  ;;  %s4808_s12 = smov 120  }
 0x347   : > { %4439 = vmatprep.subr.mxu1 %v1776_v14  ;;  %v4215_v22 = vld [vmem:[%s5423_s11] ss:$0 sm:$0xff]  ;;  %4448 = vmatprep.subr.msk.mxu0 %vm1877_vm15, %v1869_v26  ;;  %s4809_s7 = smov 112   ;;  %s4810_s11 = smov 80  }
 0x348   : > { %4440 = vmatpush3.msra.mxu1 %v1776_v14  ;;  %4449 = vmatpush3.msk.msra.mxu0 %vm1877_vm15, %v1869_v26  ;;  %v4216_v27 = vld [vmem:[%s5425_s16] ss:$0 sm:$0xff]  ;;  %s5427_s16 = scalar_lea.vmem %s4930_s19, %s4999_s0 }
 0x349   : > { %4441 = vmatprep.subr.mxu1 %v1775_v15  ;;  %v4224_v2 = vld [vmem:[%s5427_s16] ss:$0 sm:$0xff]  ;;  %4474 = vmatprep.subr.mxu0 %v4804_v9  ;;  %s4814_s16 = smov 48  }
 0x34a   : > { %4442 = vmatpush3.msra.mxu1 %v1775_v15 }
 0x34b   : > { %4443 = vmatprep.subr.mxu1 %v1774_v16  ;;  %s5426_s18 = scalar_lea.vmem %s5424_s30, %s4999_s0  ;;  %s4811_s30 = smov 104  }
 0x34c   : > { %4444 = vmatpush3.msra.mxu1 %v1774_v16  ;;  %v4222_v38 = vld [vmem:[%s5426_s18] ss:$0 sm:$0xff]  ;;  %s4813_s18 = smov 64  }
 0x34d   : > { %4453 = vmatprep.subr.mxu1 %v2015_v53 }
 0x406   : > { %v4436_v18 = vpop.f32.mrf.mxu0 }
 0x407   : > { %v1764_v20 = vadd.f32 %v4436_v18, %v1673_v17 }
 0x408   : > { %v1754_v21 = vpop.f32.mrf.mxu0 }
 0x409   : > { %v1763_v23 = vadd.f32 %v1754_v21, %v1672_v19  ;;  %v1773_v25 = vadd.f32 %v4215_v22, %v1764_v20 }
 0x40b   : > { %v1772_v24 = vadd.f32 %v4215_v22, %v1763_v23 }
 0x40d   : > { %4445 = vmatprep.mubr.msk.f32.mxu1 %vm1785_vm14, %v1772_v24 }
 0x40e   : > { %4446 = vmatmul.mubr.msk.f32.vlgmr.msra.gmra.mxu1 %vm1785_vm14, %v1773_v25 }
 0x40f   : > { %4454 = vmatpush3.msra.mxu1 %v2015_v53 }
 0x410   : > { %4455 = vmatprep.subr.mxu1 %v2014_v54 }
 0x411   : > { %4456 = vmatpush3.msra.mxu1 %v2014_v54 }
 0x412   : > { %4457 = vmatprep.subr.mxu1 %v2013_v55 }
 0x413   : > { %4458 = vmatpush3.msra.mxu1 %v2013_v55 }
 0x414   : > { %4459 = vmatprep.subr.mxu1 %v2012_v56 }
 0x415   : > { %4460 = vmatpush3.msra.mxu1 %v2012_v56 }
 0x416   : > { %4464 = vmatprep.subr.mxu1 %v4804_v9 }
 0x4ce   : > { %v4447_v28 = vpop.f32.mrf.mxu1 }
 0x4cf   : > { %v1864_v29 = vadd.f32 %v4447_v28, %v4216_v27 }
 0x4d0   : > { %v1858_v30 = vpop.f32.mrf.mxu1 }
 0x4d1   : > { %v1859_v31 = vadd.f32 %v4216_v27, %v1858_v30  ;;  %v1868_v33 = vmax.f32 %v1864_v29, 0.0  ;;  %v2104_v30 = vld [vmem:[#allocation4] sm:$0xff] }
 0x4d3   : > { %v1867_v32 = vmax.f32 %v1859_v31, 0.0 }
 0x4d5   : > { %4450 = vmatprep.mubr.msk.f32.mxu0 %vm1870_vm0, %v1867_v32 }
 0x4d6   : > { %4451 = vmatmul.mubr.msk.f32.vlgmr.msra.gmra.mxu0 %vm1870_vm0, %v1868_v33 }
 0x4d7   : > { %4476 = vmatprep.mubr.msk.f32.mxu0 %vm4805_vm1, %v4804_v9 }
 0x596   : > { %v4452_v34 = vpop.f32.mrf.mxu0 }
 0x597   : > { %v1957_v36 = vadd.f32 %v4452_v34, %v1773_v25 }
 0x598   : > { %v1947_v35 = vpop.f32.mrf.mxu0 }
 0x599   : > { %v1956_v37 = vadd.f32 %v1947_v35, %v1772_v24  ;;  %v5103_v40 = vadd.f32 %v4222_v38, %v1957_v36 }
 0x59b   : > { %v5101_v39 = vadd.f32 %v4222_v38, %v1956_v37  ;;  %v1972_v42 = vsel %vm1785_vm14, %v5103_v40, 0.0 }
 0x59d   : > { %v1969_v41 = vsel %vm1785_vm14, %v5101_v39, 0.0 }
 0x59e   : > { %1970 = vadd.xlane.f32.xlu0 %v1969_v41 }
 0x5a2   : > { %1973 = vadd.xlane.f32.xlu0 %v1972_v42 }
 0x627   : > { %v1971_v43 = vpop.xlane.xlu0 %1970 }
 0x628   : > { %v1976_v44 = vmul.f32 0.03125, %v1971_v43 }
 0x62a   : > { %v1978_v45 = vsub.f32 %v5101_v39, %v1976_v44 }
 0x62b   : > { %v1974_v46 = vpop.xlane.xlu0 %1973 }
 0x62c   : > { %v1977_v47 = vmul.f32 0.03125, %v1974_v46  ;;  %v1980_v48 = vmul.f32 %v1978_v45, %v1978_v45 }
 0x62e   : > { %v1979_v49 = vsub.f32 %v5103_v40, %v1977_v47  ;;  %v1982_v50 = vsel %vm1785_vm14, %v1980_v48, 0.0 }
 0x62f   : > { %1983 = vadd.xlane.f32.xlu1 %v1982_v50 }
 0x630   : > { %v1981_v51 = vmul.f32 %v1979_v49, %v1979_v49 }
 0x632   : > { %v1985_v52 = vsel %vm1785_vm14, %v1981_v51, 0.0 }
 0x633   : > { %1986 = vadd.xlane.f32.xlu1 %v1985_v52 }
 0x6b8   : > { %v1984_v57 = vpop.xlane.xlu1 %1983 }
 0x6b9   : > { %v1988_v58 = vmul.f32 0.03125, %v1984_v57 }
 0x6bb   : > { %v1990_v59 = vadd.f32 1e-05, %v1988_v58 }
 0x6bc   : > { %v1987_v60 = vpop.xlane.xlu1 %1986 }
 0x6bd   : > { %4680 = vrsqrt.f32 %v1990_v59  ;;  %v1989_v61 = vmul.f32 0.03125, %v1987_v60 }
 0x6bf   : > { %v1991_v62 = vadd.f32 1e-05, %v1989_v61 }
 0x6c1   : > { %4682 = vrsqrt.f32 %v1991_v62 }
 0x6ca   : > { %v4681_v63 = vpop.eup %4680 }
 0x6cb   : > { %v1994_v1 = vmul.f32 %v4681_v63, %v1978_v45 }
 0x6cd   : > { %v2002_v3 = vmul.f32 %v4223_v0, %v1994_v1 }
 0x6ce   : > { %v4683_v4 = vpop.eup %4682 }
 0x6cf   : > { %v1995_v5 = vmul.f32 %v4683_v4, %v1979_v49  ;;  %v2010_v6 = vadd.f32 %v4224_v2, %v2002_v3 }
 0x6d1   : > { %v2003_v7 = vmul.f32 %v4223_v0, %v1995_v5  ;;  %4461 = vmatprep.mubr.msk.f32.mxu1 %vm1785_vm14, %v2010_v6 }
 0x6d3   : > { %v2011_v8 = vadd.f32 %v4224_v2, %v2003_v7 }
 0x6d5   : > { %4462 = vmatmul.mubr.msk.f32.vlgmr.msra.gmra.mxu1 %vm1785_vm14, %v2011_v8 }
 0x6d6   : > { %4466 = vmatprep.mubr.msk.f32.mxu1 %vm4805_vm1, %v4804_v9 }
 0x795   : > { %v4463_v10 = vpop.f32.mrf.mxu1 }
 0x796   : > { %v5142_v14 = vadd.f32 %v4463_v10, %v4225_v11 }
 0x797   : > { %v2095_v12 = vpop.f32.mrf.mxu1 }
 0x798   : > { %v5134_v13 = vadd.f32 %v4225_v11, %v2095_v12 }
 0x79a   : > { %2274 = vrot.lane.b32.xlu1 %v5134_v13, %s4806_s22  ;;  %2106 = vrot.lane.b32.xlu0 %v5134_v13, %s4807_s28 }
 0x79e   : > { %2272 = vrot.lane.b32.xlu1 %v5134_v13, %s4808_s12  ;;  %2439 = vrot.lane.b32.xlu0 %v5134_v13, %s4809_s7 }
 0x7a2   : > { %2441 = vrot.lane.b32.xlu1 %v5134_v13, %s4810_s11  ;;  %2606 = vrot.lane.b32.xlu0 %v5134_v13, %s4811_s30 }
 0x7a6   : > { %2608 = vrot.lane.b32.xlu1 %v5134_v13, %s4812_s26  ;;  %2958 = vrot.lane.b32.xlu0 %v5142_v14, %s4806_s22  ;;  %s4815_s22 = smov 40  }
 0x7aa   : > { %2791 = vrot.lane.b32.xlu1 %v5142_v14, %s4807_s28  ;;  %3125 = vrot.lane.b32.xlu0 %v5142_v14, %s4810_s11  ;;  %s4816_s28 = smov 56   ;;  %s4819_s11 = smov 24  }
 0x7ae   : > { %2956 = vrot.lane.b32.xlu1 %v5142_v14, %s4808_s12  ;;  %3292 = vrot.lane.b32.xlu0 %v5142_v14, %s4812_s26  ;;  %s4817_s12 = smov 8  }
 0x7b2   : > { %3123 = vrot.lane.b32.xlu1 %v5142_v14, %s4809_s7  ;;  %s4818_s7 = smov 16  }
 0x7b6   : > { %3290 = vrot.lane.b32.xlu1 %v5142_v14, %s4811_s30  ;;  %s5429_s30 = scalar_lea.vmem %s4960_s17, %s4999_s0 }
 0x80c   : > { %v2275_v15 = vpop.permute.xlu1 %2274  ;;  %v2107_v16 = vpop.permute.xlu0 %2106 }
 0x80d   : > { %4465 = vmatpush3.xpose.msk.msra.mxu1 %vm2108_vm2, %v2107_v16  ;;  %4475 = vmatpush3.xpose.msk.msra.mxu0 %vm2108_vm2, %v2275_v15 }
 0x80e   : > { %4484 = vmatprep.subr.mxu0 %v4804_v9  ;;  %4469 = vmatprep.subr.mxu1 %v4804_v9 }
 0x810   : > { %v2273_v17 = vpop.permute.xlu1 %2272  ;;  %4467 = vmatmul.mubr.msk.f32.vlgmr.msra.gmra.mxu1 %vm2108_vm2, %v5134_v13  ;;  %v2440_v18 = vpop.permute.xlu0 %2439 }
 0x811   : > { %4477 = vmatmul.mubr.msk.f32.vlgmr.msra.gmra.mxu0 %vm2108_vm2, %v2273_v17  ;;  %4471 = vmatprep.mubr.msk.f32.mxu1 %vm4805_vm1, %v4804_v9 }
 0x812   : > { %4486 = vmatprep.mubr.msk.f32.mxu0 %vm4805_vm1, %v4804_v9 }
 0x814   : > { %v2442_v19 = vpop.permute.xlu1 %2441  ;;  %v2607_v20 = vpop.permute.xlu0 %2606 }
 0x815   : > { %4485 = vmatpush3.xpose.msk.msra.mxu0 %vm2108_vm2, %v2442_v19 }
 0x816   : > { %4494 = vmatprep.subr.mxu0 %v4804_v9 }
 0x818   : > { %v2609_v21 = vpop.permute.xlu1 %2608  ;;  %4487 = vmatmul.mubr.msk.f32.vlgmr.msra.gmra.mxu0 %vm2108_vm2, %v2440_v18  ;;  %v2959_v22 = vpop.permute.xlu0 %2958 }
 0x819   : > { %4495 = vmatpush3.xpose.msk.msra.mxu0 %vm2108_vm2, %v2609_v21  ;;  %4496 = vmatprep.mubr.msk.f32.mxu0 %vm4805_vm1, %v4804_v9 }
 0x81a   : > { %4504 = vmatprep.subr.mxu0 %v4804_v9 }
 0x81c   : > { %v2792_v23 = vpop.permute.xlu1 %2791  ;;  %4497 = vmatmul.mubr.msk.f32.vlgmr.msra.gmra.mxu0 %vm2108_vm2, %v2607_v20  ;;  %v3126_v25 = vpop.permute.xlu0 %3125 }
 0x81d   : > { %4505 = vmatpush3.xpose.msk.msra.mxu0 %vm2108_vm2, %v2792_v23  ;;  %4506 = vmatprep.mubr.msk.f32.mxu0 %vm4805_vm1, %v4804_v9 }
 0x81e   : > { %4514 = vmatprep.subr.mxu0 %v4804_v9 }
 0x820   : > { %v2957_v24 = vpop.permute.xlu1 %2956  ;;  %4507 = vmatmul.mubr.msk.f32.vlgmr.msra.gmra.mxu0 %vm2108_vm2, %v5142_v14  ;;  %v3293_v27 = vpop.permute.xlu0 %3292 }
 0x821   : > { %4515 = vmatpush3.xpose.msk.msra.mxu0 %vm2108_vm2, %v2959_v22  ;;  %4516 = vmatprep.mubr.msk.f32.mxu0 %vm4805_vm1, %v4804_v9 }
 0x822   : > { %4524 = vmatprep.subr.mxu0 %v4804_v9 }
 0x824   : > { %4517 = vmatmul.mubr.msk.f32.vlgmr.msra.gmra.mxu0 %vm2108_vm2, %v2957_v24  ;;  %v3124_v26 = vpop.permute.xlu1 %3123 }
 0x825   : > { %4525 = vmatpush3.xpose.msk.msra.mxu0 %vm2108_vm2, %v3126_v25  ;;  %4526 = vmatprep.mubr.msk.f32.mxu0 %vm4805_vm1, %v4804_v9 }
 0x826   : > { %4534 = vmatprep.subr.mxu0 %v4804_v9 }
 0x828   : > { %4527 = vmatmul.mubr.msk.f32.vlgmr.msra.gmra.mxu0 %vm2108_vm2, %v3124_v26  ;;  %v3291_v28 = vpop.permute.xlu1 %3290 }
 0x829   : > { %4535 = vmatpush3.xpose.msk.msra.mxu0 %vm2108_vm2, %v3293_v27  ;;  %4536 = vmatprep.mubr.msk.f32.mxu0 %vm4805_vm1, %v4804_v9 }
 0x82c   : > { %4537 = vmatmul.mubr.msk.f32.vlgmr.msra.gmra.mxu0 %vm2108_vm2, %v3291_v28 }
 0x8d0   : > { %v2179_v29 = vpop.f32.mrf.mxu1 }
 0x8d1   : > { %v2183_v31 = vmul.f32 0.35355338, %v2179_v29  ;;  %v2346_v32 = vpop.f32.mrf.mxu0 }
 0x8d2   : > { %v2350_v33 = vmul.f32 0.35355338, %v2346_v32  ;;  %v4468_v34 = vpop.f32.mrf.mxu1 }
 0x8d3   : > { %v4478_v35 = vpop.f32.mrf.mxu0  ;;  %v2184_v36 = vadd.f32 %v2183_v31, %v2104_v30 }
 0x8d4   : > { %v2351_v37 = vadd.f32 %v2350_v33, %v2104_v30 }
 0x8d5   : > { %v2185_v38 = vsel %vm2108_vm2, %v2184_v36, -inf }
 0x8d6   : > { %2186 = vmax.xlane.f32.xlu0 %v2185_v38  ;;  %v2352_v41 = vsel %vm2108_vm2, %v2351_v37, -inf }
 0x8d7   : > { %2353 = vmax.xlane.f32.xlu1 %v2352_v41 }
 0x8d8   : > { %v2513_v42 = vpop.f32.mrf.mxu0 }
 0x8d9   : > { %v2517_v43 = vmul.f32 0.35355338, %v2513_v42 }
 0x8da   : > { %v4488_v44 = vpop.f32.mrf.mxu0 }
 0x8db   : > { %v5193_v45 = vadd.f32 %v2517_v43, %v2104_v30 }
 0x8dc   : > { %v2680_v46 = vpop.f32.mrf.mxu0 }
 0x8dd   : > { %v2684_v47 = vmul.f32 0.35355338, %v2680_v46  ;;  %v2519_v48 = vsel %vm2108_vm2, %v5193_v45, -inf }
 0x8de   : > { %2520 = vmax.xlane.f32.xlu0 %v2519_v48  ;;  %v4498_v49 = vpop.f32.mrf.mxu0 }
 0x8df   : > { %v2685_v50 = vadd.f32 %v2684_v47, %v2104_v30 }
 0x8e0   : > { %v2863_v51 = vpop.f32.mrf.mxu0 }
 0x8e1   : > { %v2867_v52 = vmul.f32 0.35355338, %v2863_v51  ;;  %v2686_v53 = vsel %vm2108_vm2, %v2685_v50, -inf }
 0x8e2   : > { %2687 = vmax.xlane.f32.xlu0 %v2686_v53  ;;  %v4508_v54 = vpop.f32.mrf.mxu0 }
 0x8e3   : > { %v5198_v55 = vadd.f32 %v2867_v52, %v2104_v30 }
 0x8e4   : > { %v3030_v56 = vpop.f32.mrf.mxu0 }
 0x8e5   : > { %v3034_v57 = vmul.f32 0.35355338, %v3030_v56  ;;  %v2869_v58 = vsel %vm2108_vm2, %v5198_v55, -inf }
 0x8e6   : > { %2870 = vmax.xlane.f32.xlu0 %v2869_v58  ;;  %v4518_v59 = vpop.f32.mrf.mxu0 }
 0x8e7   : > { %v3035_v60 = vadd.f32 %v3034_v57, %v2104_v30 }
 0x8e8   : > { %v3197_v61 = vpop.f32.mrf.mxu0 }
 0x8e9   : > { %v3201_v62 = vmul.f32 0.35355338, %v3197_v61  ;;  %v3036_v63 = vsel %vm2108_vm2, %v3035_v60, -inf }
 0x8ea   : > { %3037 = vmax.xlane.f32.xlu1 %v3036_v63  ;;  %v4528_v0 = vpop.f32.mrf.mxu0 }
 0x8eb   : > { %v3202_v1 = vadd.f32 %v3201_v62, %v2104_v30 }
 0x8ec   : > { %v3364_v2 = vpop.f32.mrf.mxu0 }
 0x8ed   : > { %v3203_v3 = vsel %vm2108_vm2, %v3202_v1, -inf  ;;  %v3368_v5 = vmul.f32 0.35355338, %v3364_v2 }
 0x8ee   : > { %3204 = vmax.xlane.f32.xlu0 %v3203_v3  ;;  %v4538_v4 = vpop.f32.mrf.mxu0 }
 0x8ef   : > { %v3369_v6 = vadd.f32 %v3368_v5, %v2104_v30 }
 0x8f1   : > { %v3370_v7 = vsel %vm2108_vm2, %v3369_v6, -inf }
 0x8fb   : > { %2196 = vrot.lane.b32.xlu1 %v5134_v13, %s4813_s18 }
 0x91f   : > { %3371 = vmax.xlane.f32.xlu1 %v3370_v7 }
 0x930   : > { %2530 = vrot.lane.b32.xlu1 %v5134_v13, %s4814_s16 }
 0x934   : > { %2697 = vrot.lane.b32.xlu1 %v5134_v13, %s4815_s22 }
 0x938   : > { %2880 = vrot.lane.b32.xlu1 %v5142_v14, %s4813_s18 }
 0x95f   : > { %v2187_v8 = vpop.xlane.xlu0 %2186 }
 0x960   : > { %v2188_v10 = vsub.f32 %v2184_v36, %v2187_v8  ;;  %v2354_v11 = vpop.xlane.xlu1 %2353 }
 0x961   : > { %v2355_v12 = vsub.f32 %v2351_v37, %v2354_v11 }
 0x962   : > { %v2189_v15 = vmul.f32 1.442695, %v2188_v10 }
 0x963   : > { %v2356_v16 = vmul.f32 1.442695, %v2355_v12 }
 0x964   : > { %4684 = vpow2.f32 %v2189_v15 }
 0x965   : > { %4686 = vpow2.f32 %v2356_v16 }
 0x967   : > { %v2521_v17 = vpop.xlane.xlu0 %2520 }
 0x968   : > { %v2522_v29 = vsub.f32 %v5193_v45, %v2521_v17 }
 0x96a   : > { %v2523_v31 = vmul.f32 1.442695, %v2522_v29 }
 0x96b   : > { %v2688_v18 = vpop.xlane.xlu0 %2687 }
 0x96c   : > { %v2689_v19 = vsub.f32 %v2685_v50, %v2688_v18 }
 0x96e   : > { %v2690_v20 = vmul.f32 1.442695, %v2689_v19 }
 0x96f   : > { %v2871_v30 = vpop.xlane.xlu0 %2870 }
 0x970   : > { %4688 = vpow2.f32 %v2690_v20  ;;  %v2872_v32 = vsub.f32 %v5198_v55, %v2871_v30  ;;  %v3473_v30 = vld [vmem:[%s5029_s6 + $0x8] sm:$0xff] }
 0x971   : > { %v4685_v21 = vpop.eup %4684  ;;  %4690 = vpow2.f32 %v2523_v31  ;;  %v3472_v31 = vld [vmem:[%s5029_s6] sm:$0xff] }
 0x972   : > { %v5211_v22 = vpop.eup %4686  ;;  %v2191_v23 = vsel %vm2108_vm2, %v4685_v21, 0.0  ;;  %v2873_v34 = vmul.f32 1.442695, %v2872_v32 }
 0x973   : > { %v3038_v24 = vpop.xlane.xlu1 %3037  ;;  %2192 = vadd.xlane.f32.xlu0 %v2191_v23  ;;  %v2358_v25 = vsel %vm2108_vm2, %v5211_v22, 0.0 }
 0x974   : > { %2359 = vadd.xlane.f32.xlu1 %v2358_v25  ;;  %4692 = vpow2.f32 %v2873_v34  ;;  %v3039_v36 = vsub.f32 %v3035_v60, %v3038_v24 }
 0x976   : > { %v3040_v38 = vmul.f32 1.442695, %v3039_v36 }
 0x977   : > { %v2197_v26 = vpop.permute.xlu1 %2196  ;;  %v3205_v33 = vpop.xlane.xlu0 %3204 }
 0x978   : > { %4470 = vmatpush3.msra.mxu1 %v2197_v26  ;;  %v3206_v35 = vsub.f32 %v3202_v1, %v3205_v33 }
 0x979   : > { %4479 = vmatprep.subr.mxu1 %v4804_v9 }
 0x97a   : > { %v3207_v37 = vmul.f32 1.442695, %v3206_v35 }
 0x97c   : > { %4694 = vpow2.f32 %v3207_v37 }
 0x97d   : > { %v5217_v27 = vpop.eup %4688  ;;  %4696 = vpow2.f32 %v3040_v38 }
 0x97e   : > { %v2692_v28 = vsel %vm2108_vm2, %v5217_v27, 0.0  ;;  %v4691_v41 = vpop.eup %4690 }
 0x97f   : > { %2693 = vadd.xlane.f32.xlu1 %v2692_v28  ;;  %v3474_v28 = vld [vmem:[%s5029_s6 + $0x10] sm:$0xff] }
 0x981   : > { %v5226_v42 = vpop.eup %4692 }
 0x982   : > { %v2875_v46 = vsel %vm2108_vm2, %v5226_v42, 0.0 }
 0x989   : > { %2363 = vrot.lane.b32.xlu0 %v5134_v13, %s4816_s28  ;;  %v2525_v13 = vsel %vm2108_vm2, %v4691_v41, 0.0  ;;  %v5230_v47 = vpop.eup %4694 }
 0x98a   : > { %v3209_v48 = vsel %vm2108_vm2, %v5230_v47, 0.0  ;;  %v4697_v49 = vpop.eup %4696 }
 0x98b   : > { %v3042_v50 = vsel %vm2108_vm2, %v4697_v49, 0.0 }
 0x990   : > { %3047 = vrot.lane.b32.xlu1 %v5142_v14, %s4816_s28 }
 0x9a8   : > { %v3372_v43 = vpop.xlane.xlu1 %3371  ;;  %2526 = vadd.xlane.f32.xlu0 %v2525_v13 }
 0x9a9   : > { %v3373_v44 = vsub.f32 %v3369_v6, %v3372_v43 }
 0x9ab   : > { %v3374_v45 = vmul.f32 1.442695, %v3373_v44 }
 0x9ac   : > { %2876 = vadd.xlane.f32.xlu0 %v2875_v46  ;;  %v2531_v53 = vpop.permute.xlu1 %2530 }
 0x9ad   : > { %4698 = vpow2.f32 %v3374_v45 }
 0x9b0   : > { %3210 = vadd.xlane.f32.xlu0 %v3209_v48  ;;  %v2698_v54 = vpop.permute.xlu1 %2697 }
 0x9b4   : > { %3043 = vadd.xlane.f32.xlu1 %v3042_v50  ;;  %v2881_v55 = vpop.permute.xlu1 %2880 }
 0x9ba   : > { %v5235_v51 = vpop.eup %4698 }
 0x9bb   : > { %v3376_v52 = vsel %vm2108_vm2, %v5235_v51, 0.0 }
 0x9bc   : > { %3377 = vadd.xlane.f32.xlu0 %v3376_v52 }
 0x9c5   : > { %3381 = vrot.lane.b32.xlu1 %v5142_v14, %s4815_s22 }
 0x9d2   : > { %3214 = vrot.lane.b32.xlu0 %v5142_v14, %s4814_s16 }
 0x9fc   : > { %v2193_v56 = vpop.xlane.xlu0 %2192 }
 0x9fd   : > { %4700 = vrcp.f32 %v2193_v56  ;;  %v2360_v57 = vpop.xlane.xlu1 %2359 }
 0x9fe   : > { %4702 = vrcp.f32 %v2360_v57 }
 0xa00   : > { %v2364_v61 = vpop.permute.xlu0 %2363 }
 0xa08   : > { %v2694_v62 = vpop.xlane.xlu1 %2693 }
 0xa0a   : > { %v4701_v58 = vpop.eup %4700 }
 0xa0b   : > { %v2195_v59 = vmul.f32 %v4701_v58, %v4685_v21  ;;  %v4703_v60 = vpop.eup %4702 }
 0xa0c   : > { %v2362_v14 = vmul.f32 %v4703_v60, %v5211_v22  ;;  %v3048_v1 = vpop.permute.xlu1 %3047 }
 0xa0d   : > { %4472 = vmatmul.mubr.msk.f32.vlgmr.msra.gmra.mxu1 %vm2108_vm2, %v2195_v59 }
 0xa0e   : > { %4480 = vmatpush3.msra.mxu1 %v2364_v61  ;;  %4481 = vmatprep.mubr.msk.f32.mxu1 %vm4805_vm1, %v4804_v9 }
 0xa0f   : > { %4489 = vmatprep.subr.mxu1 %v4804_v9 }
 0xa11   : > { %4482 = vmatmul.mubr.msk.f32.vlgmr.msra.gmra.mxu1 %vm2108_vm2, %v2362_v14 }
 0xa12   : > { %4490 = vmatpush3.msra.mxu1 %v2531_v53  ;;  %4491 = vmatprep.mubr.msk.f32.mxu1 %vm4805_vm1, %v4804_v9 }
 0xa13   : > { %4499 = vmatprep.subr.mxu1 %v4804_v9 }
 0xa31   : > { %v2527_v63 = vpop.xlane.xlu0 %2526 }
 0xa32   : > { %4704 = vrcp.f32 %v2527_v63 }
 0xa33   : > { %4706 = vrcp.f32 %v2694_v62 }
 0xa35   : > { %v2877_v0 = vpop.xlane.xlu0 %2876 }
 0xa36   : > { %4708 = vrcp.f32 %v2877_v0 }
 0xa39   : > { %v3211_v2 = vpop.xlane.xlu0 %3210 }
 0xa3d   : > { %v3044_v3 = vpop.xlane.xlu1 %3043 }
 0xa3e   : > { %4710 = vrcp.f32 %v3044_v3 }
 0xa3f   : > { %v4705_v4 = vpop.eup %4704  ;;  %4712 = vrcp.f32 %v3211_v2 }
 0xa40   : > { %v2529_v5 = vmul.f32 %v4705_v4, %v4691_v41  ;;  %v4707_v6 = vpop.eup %4706 }
 0xa41   : > { %v2696_v7 = vmul.f32 %v4707_v6, %v5217_v27  ;;  %v3382_v19 = vpop.permute.xlu1 %3381  ;;  %v3475_v27 = vld [vmem:[%s5029_s6 + $0x18] sm:$0xff]  ;;  %s5428_s6 = scalar_lea.vmem %s4950_s8, %s4999_s0 }
 0xa42   : > { %4492 = vmatmul.mubr.msk.f32.vlgmr.msra.gmra.mxu1 %vm2108_vm2, %v2529_v5  ;;  %v3615_v6 = vld [vmem:[%s5038_s20 + $0x18] sm:$0xff] }
 0xa43   : > { %4500 = vmatpush3.msra.mxu1 %v2698_v54  ;;  %4501 = vmatprep.mubr.msk.f32.mxu1 %vm4805_vm1, %v4804_v9  ;;  %v4709_v8 = vpop.eup %4708 }
 0xa44   : > { %4509 = vmatprep.subr.mxu1 %v4804_v9  ;;  %v2879_v11 = vmul.f32 %v4709_v8, %v5226_v42  ;;  %v3613_v8 = vld [vmem:[%s5038_s20 + $0x8] sm:$0xff] }
 0xa45   : > { %v3378_v10 = vpop.xlane.xlu0 %3377 }
 0xa46   : > { %4714 = vrcp.f32 %v3378_v10  ;;  %4502 = vmatmul.mubr.msk.f32.vlgmr.msra.gmra.mxu1 %vm2108_vm2, %v2696_v7  ;;  %v3614_v7 = vld [vmem:[%s5038_s20 + $0x10] sm:$0xff]  ;;  %v3612_v10 = vld [vmem:[%s5038_s20] sm:$0xff]  ;;  %s5430_s20 = scalar_lea.vmem %s4980_s13, %s4999_s0 }
 0xa47   : > { %4510 = vmatpush3.msra.mxu1 %v2881_v55  ;;  %4511 = vmatprep.mubr.msk.f32.mxu1 %vm4805_vm1, %v4804_v9  ;;  %v4254_v55 = vld [vmem:[%s5428_s6] ss:$0 sm:$0xff] }
 0xa48   : > { %4519 = vmatprep.subr.mxu1 %v4804_v9 }
 0xa49   : > { %v3215_v17 = vpop.permute.xlu0 %3214 }
 0xa4a   : > { %4512 = vmatmul.mubr.msk.f32.vlgmr.msra.gmra.mxu1 %vm2108_vm2, %v2879_v11 }
 0xa4b   : > { %v4711_v12 = vpop.eup %4710  ;;  %4520 = vmatpush3.msra.mxu1 %v3048_v1  ;;  %4521 = vmatprep.mubr.msk.f32.mxu1 %vm4805_vm1, %v4804_v9 }
 0xa4c   : > { %4529 = vmatprep.subr.mxu1 %v4804_v9  ;;  %v3046_v15 = vmul.f32 %v4711_v12, %v4697_v49  ;;  %v4713_v16 = vpop.eup %4712 }
 0xa4d   : > { %v3213_v18 = vmul.f32 %v4713_v16, %v5230_v47 }
 0xa4e   : > { %4522 = vmatmul.mubr.msk.f32.vlgmr.msra.gmra.mxu1 %vm2108_vm2, %v3046_v15 }
 0xa4f   : > { %4530 = vmatpush3.msra.mxu1 %v3215_v17  ;;  %4531 = vmatprep.mubr.msk.f32.mxu1 %vm4805_vm1, %v4804_v9 }
 0xa50   : > { %4539 = vmatprep.subr.mxu1 %v4804_v9 }
 0xa52   : > { %4532 = vmatmul.mubr.msk.f32.vlgmr.msra.gmra.mxu1 %vm2108_vm2, %v3213_v18 }
 0xa53   : > { %v4715_v20 = vpop.eup %4714  ;;  %4540 = vmatpush3.msra.mxu1 %v3382_v19  ;;  %4541 = vmatprep.mubr.msk.f32.mxu1 %vm4805_vm1, %v4804_v9 }
 0xa54   : > { %v3380_v21 = vmul.f32 %v4715_v20, %v5235_v51  ;;  %4544 = vmatprep.subr.mxu1 %v3475_v27  ;;  %v4255_v20 = vld [vmem:[%s1193_s2] ss:$0 sm:$0xff] }
 0xa56   : > { %4542 = vmatmul.mubr.msk.f32.vlgmr.msra.gmra.mxu1 %vm2108_vm2, %v3380_v21 }
 0xa57   : > { %4545 = vmatpush3.msra.mxu1 %v3475_v27 }
 0xa58   : > { %4546 = vmatprep.subr.mxu1 %v3474_v28 }
 0xa59   : > { %4547 = vmatpush3.msra.mxu1 %v3474_v28 }
 0xa5a   : > { %4548 = vmatprep.subr.mxu1 %v3473_v30 }
 0xa5b   : > { %4549 = vmatpush3.msra.mxu1 %v3473_v30  ;;  %v3735_v30 = vld [vmem:[%s5044_s27 + $0x68] sm:$0xff] }
 0xa5c   : > { %4550 = vmatprep.subr.mxu1 %v3472_v31 }
 0xa5d   : > { %4551 = vmatpush3.msra.mxu1 %v3472_v31  ;;  %v3734_v31 = vld [vmem:[%s5044_s27 + $0x60] sm:$0xff] }
 0xa5e   : > { %4555 = vmatprep.subr.mxu1 %v3615_v6 }
 0xacd   : > { %v2268_v22 = vpop.f32.mrf.mxu1 }
 0xacf   : > { %v4473_v23 = vpop.f32.mrf.mxu1 }
 0xad1   : > { %v2435_v24 = vpop.f32.mrf.mxu1 }
 0xad2   : > { %2774 = vrot.lane.b32.xlu0 %v2435_v24, %s4817_s12 }
 0xad3   : > { %v4483_v25 = vpop.f32.mrf.mxu1 }
 0xb02   : > { %v2602_v26 = vpop.f32.mrf.mxu1 }
 0xb03   : > { %2778 = vrot.lane.b32.xlu1 %v2602_v26, %s4818_s7 }
 0xb04   : > { %v4493_v9 = vpop.f32.mrf.mxu1 }
 0xb05   : > { %v3737_v9 = vld [vmem:[%s5044_s27 + $0x78] sm:$0xff] }
 0xb06   : > { %v2769_v29 = vpop.f32.mrf.mxu1  ;;  %4566 = vmatprep.subr.mxu0 %v3737_v9 }
 0xb07   : > { %2782 = vrot.lane.b32.xlu1 %v2769_v29, %s4819_s11  ;;  %4567 = vmatpush3.msra.mxu0 %v3737_v9  ;;  %v3736_v29 = vld [vmem:[%s5044_s27 + $0x70] sm:$0xff] }
 0xb08   : > { %v4503_v32 = vpop.f32.mrf.mxu1  ;;  %4568 = vmatprep.subr.mxu0 %v3736_v29 }
 0xb09   : > { %4569 = vmatpush3.msra.mxu0 %v3736_v29  ;;  %v3733_v32 = vld [vmem:[%s5044_s27 + $0x58] sm:$0xff] }
 0xb0a   : > { %v2952_v33 = vpop.f32.mrf.mxu1  ;;  %4570 = vmatprep.subr.mxu0 %v3735_v30 }
 0xb0b   : > { %4571 = vmatpush3.msra.mxu0 %v3735_v30 }
 0xb0c   : > { %v4513_v34 = vpop.f32.mrf.mxu1  ;;  %4572 = vmatprep.subr.mxu0 %v3734_v31 }
 0xb0d   : > { %4573 = vmatpush3.msra.mxu0 %v3734_v31  ;;  %v3731_v34 = vld [vmem:[%s5044_s27 + $0x48] sm:$0xff] }
 0xb0e   : > { %v3119_v35 = vpop.f32.mrf.mxu1  ;;  %4574 = vmatprep.subr.mxu0 %v3733_v32 }
 0xb0f   : > { %3458 = vrot.lane.b32.xlu0 %v3119_v35, %s4817_s12  ;;  %4575 = vmatpush3.msra.mxu0 %v3733_v32  ;;  %v3730_v35 = vld [vmem:[%s5044_s27 + $0x40] sm:$0xff] }
 0xb10   : > { %v4523_v36 = vpop.f32.mrf.mxu1 }
 0xb11   : > { %v3729_v36 = vld [vmem:[%s5044_s27 + $0x38] sm:$0xff] }
 0xb12   : > { %v3286_v37 = vpop.f32.mrf.mxu1 }
 0xb13   : > { %3462 = vrot.lane.b32.xlu0 %v3286_v37, %s4818_s7  ;;  %v3728_v37 = vld [vmem:[%s5044_s27 + $0x30] sm:$0xff] }
 0xb14   : > { %v4533_v38 = vpop.f32.mrf.mxu1 }
 0xb15   : > { %v3727_v38 = vld [vmem:[%s5044_s27 + $0x28] sm:$0xff] }
 0xb16   : > { %v3453_v41 = vpop.f32.mrf.mxu1 }
 0xb17   : > { %3466 = vrot.lane.b32.xlu1 %v3453_v41, %s4819_s11  ;;  %v3726_v41 = vld [vmem:[%s5044_s27 + $0x20] sm:$0xff] }
 0xb18   : > { %v4543_v13 = vpop.f32.mrf.mxu1 }
 0xb19   : > { %v3725_v13 = vld [vmem:[%s5044_s27 + $0x18] sm:$0xff] }
 0xb44   : > { %v2775_v42 = vpop.permute.xlu0 %2774 }
 0xb45   : > { %v2785_v44 = vsel %vm2108_vm2, %v2268_v22, %v2775_v42  ;;  %v4256_v22 = vld [vmem:[%s5429_s30] ss:$0 sm:$0xff]  ;;  %v3724_v42 = vld [vmem:[%s5044_s27 + $0x10] sm:$0xff] }
 0xb75   : > { %v2779_v43 = vpop.permute.xlu1 %2778 }
 0xb76   : > { %v2787_v45 = vsel %vm2786_vm3, %v2785_v44, %v2779_v43  ;;  %v3723_v43 = vld [vmem:[%s5044_s27 + $0x8] sm:$0xff]  ;;  %v3722_v44 = vld [vmem:[%s5044_s27] sm:$0xff] }
 0xb79   : > { %v2783_v46 = vpop.permute.xlu1 %2782 }
 0xb7a   : > { %v2789_v47 = vsel %vm2788_vm4, %v2787_v45, %v2783_v46  ;;  %v4257_v45 = vld [vmem:[%s1204_s10] ss:$0 sm:$0xff] }
 0xb7b   : > { %4552 = vmatprep.mubr.msk.f32.mxu1 %vm1785_vm14, %v2789_v47 }
 0xb81   : > { %v3459_v48 = vpop.permute.xlu0 %3458 }
 0xb82   : > { %v3469_v50 = vsel %vm2108_vm2, %v2952_v33, %v3459_v48  ;;  %v3732_v33 = vld [vmem:[%s5044_s27 + $0x50] sm:$0xff]  ;;  %s5431_s27 = sld [smem:[#allocation29_spill]] }
 0xb83   : > { %4576 = vmatprep.subr.mxu0 %v3732_v33 }
 0xb84   : > { %4577 = vmatpush3.msra.mxu0 %v3732_v33 }
 0xb85   : > { %v3463_v49 = vpop.permute.xlu0 %3462  ;;  %4578 = vmatprep.subr.mxu0 %v3731_v34 }
 0xb86   : > { %v3470_v51 = vsel %vm2786_vm3, %v3469_v50, %v3463_v49  ;;  %4579 = vmatpush3.msra.mxu0 %v3731_v34 }
 0xb87   : > { %4580 = vmatprep.subr.mxu0 %v3730_v35 }
 0xb88   : > { %4581 = vmatpush3.msra.mxu0 %v3730_v35  ;;  %p4261_p5 = scmp.ne.s32.totalorder %s5431_s27, 1 }
 0xb89   : > { %v3467_v52 = vpop.permute.xlu1 %3466  ;;  %4582 = vmatprep.subr.mxu0 %v3729_v36  ;;  %s5432_s2 = sld [smem:[#allocation19_spill]] (!%p4261_p5) }
 0xb8a   : > { %v3471_v53 = vsel %vm2788_vm4, %v3470_v51, %v3467_v52  ;;  %4583 = vmatpush3.msra.mxu0 %v3729_v36  ;;  %s5433_s0 = sld [smem:[#allocation20_spill]] (!%p4261_p5) }
 0xb8b   : > { %4553 = vmatmul.mubr.msk.f32.vlgmr.msra.gmra.mxu1 %vm1785_vm14, %v3471_v53  ;;  %4584 = vmatprep.subr.mxu0 %v3728_v37 }
 0xb8c   : > { %4556 = vmatpush3.msra.mxu1 %v3615_v6  ;;  %4585 = vmatpush3.msra.mxu0 %v3728_v37 }
 0xb8d   : > { %4557 = vmatprep.subr.mxu1 %v3614_v7  ;;  %4586 = vmatprep.subr.mxu0 %v3727_v38 }
 0xb8e   : > { %4558 = vmatpush3.msra.mxu1 %v3614_v7  ;;  %4587 = vmatpush3.msra.mxu0 %v3727_v38 }
 0xb8f   : > { %4559 = vmatprep.subr.mxu1 %v3613_v8  ;;  %4588 = vmatprep.subr.mxu0 %v3726_v41 }
 0xb90   : > { %4560 = vmatpush3.msra.mxu1 %v3613_v8  ;;  %4589 = vmatpush3.msra.mxu0 %v3726_v41 }
 0xb91   : > { %4561 = vmatprep.subr.mxu1 %v3612_v10  ;;  %4590 = vmatprep.subr.mxu0 %v3725_v13 }
 0xb92   : > { %4562 = vmatpush3.msra.mxu1 %v3612_v10  ;;  %4591 = vmatpush3.msra.mxu0 %v3725_v13 }
 0xb93   : > { %4592 = vmatprep.subr.mxu0 %v3724_v42 }
 0xb94   : > { %4593 = vmatpush3.msra.mxu0 %v3724_v42 }
 0xb95   : > { %4594 = vmatprep.subr.mxu0 %v3723_v43 }
 0xb96   : > { %4595 = vmatpush3.msra.mxu0 %v3723_v43 }
 0xb97   : > { %4596 = vmatprep.subr.mxu0 %v3722_v44 }
 0xb98   : > { %4597 = vmatpush3.msra.mxu0 %v3722_v44 }
 0xc4b   : > { %v4554_v54 = vpop.f32.mrf.mxu1 }
 0xc4c   : > { %v3558_v56 = vadd.f32 %v4554_v54, %v5103_v40 }
 0xc4d   : > { %v3548_v57 = vpop.f32.mrf.mxu1 }
 0xc4e   : > { %v5292_v58 = vadd.f32 %v4254_v55, %v3558_v56  ;;  %v3557_v59 = vadd.f32 %v3548_v57, %v5101_v39 }
 0xc50   : > { %v5295_v60 = vadd.f32 %v4254_v55, %v3557_v59  ;;  %v3573_v61 = vsel %vm1785_vm14, %v5292_v58, 0.0 }
 0xc51   : > { %3574 = vadd.xlane.f32.xlu1 %v3573_v61 }
 0xc52   : > { %v3570_v14 = vsel %vm1785_vm14, %v5295_v60, 0.0 }
 0xc53   : > { %3571 = vadd.xlane.f32.xlu0 %v3570_v14 }
 0xcda   : > { %v3575_v62 = vpop.xlane.xlu1 %3574 }
 0xcdb   : > { %v3577_v40 = vmul.f32 0.03125, %v3575_v62 }
 0xcdc   : > { %v3572_v63 = vpop.xlane.xlu0 %3571 }
 0xcdd   : > { %v3576_v0 = vmul.f32 0.03125, %v3572_v63  ;;  %v3579_v1 = vsub.f32 %v5292_v58, %v3577_v40 }
 0xcdf   : > { %v3578_v39 = vsub.f32 %v5295_v60, %v3576_v0  ;;  %v3581_v4 = vmul.f32 %v3579_v1, %v3579_v1 }
 0xce1   : > { %v3580_v2 = vmul.f32 %v3578_v39, %v3578_v39  ;;  %v3585_v5 = vsel %vm1785_vm14, %v3581_v4, 0.0  ;;  %v4260_v4 = vld [vmem:[%s5430_s20] ss:$0 sm:$0xff] }
 0xce3   : > { %v3582_v3 = vsel %vm1785_vm14, %v3580_v2, 0.0 }
 0xce4   : > { %3583 = vadd.xlane.f32.xlu0 %v3582_v3 }
 0xce8   : > { %3586 = vadd.xlane.f32.xlu0 %v3585_v5 }
 0xd6d   : > { %v3584_v11 = vpop.xlane.xlu0 %3583 }
 0xd6e   : > { %v3588_v12 = vmul.f32 0.03125, %v3584_v11 }
 0xd70   : > { %v3590_v15 = vadd.f32 1e-05, %v3588_v12 }
 0xd71   : > { %v3587_v16 = vpop.xlane.xlu0 %3586 }
 0xd72   : > { %4716 = vrsqrt.f32 %v3590_v15  ;;  %v3589_v17 = vmul.f32 0.03125, %v3587_v16 }
 0xd74   : > { %v3591_v18 = vadd.f32 1e-05, %v3589_v17 }
 0xd76   : > { %4718 = vrsqrt.f32 %v3591_v18 }
 0xd7f   : > { %v4717_v19 = vpop.eup %4716 }
 0xd80   : > { %v3594_v21 = vmul.f32 %v4717_v19, %v3578_v39 }
 0xd82   : > { %v3602_v23 = vmul.f32 %v4255_v20, %v3594_v21 }
 0xd83   : > { %v4719_v24 = vpop.eup %4718 }
 0xd84   : > { %v3595_v25 = vmul.f32 %v4719_v24, %v3579_v1  ;;  %v3610_v26 = vadd.f32 %v4256_v22, %v3602_v23 }
 0xd86   : > { %v3603_v27 = vmul.f32 %v4255_v20, %v3595_v25  ;;  %4563 = vmatprep.mubr.msk.f32.mxu1 %vm1785_vm14, %v3610_v26 }
 0xd88   : > { %v3611_v28 = vadd.f32 %v4256_v22, %v3603_v27 }
 0xd8a   : > { %4564 = vmatmul.mubr.msk.f32.vlgmr.msra.gmra.mxu1 %vm1785_vm14, %v3611_v28 }
 0xe4a   : > { %v4565_v46 = vpop.f32.mrf.mxu1 }
 0xe4b   : > { %v3701_v47 = vadd.f32 %v4565_v46, %v4257_v45 }
 0xe4c   : > { %v3695_v48 = vpop.f32.mrf.mxu1 }
 0xe4d   : > { %v3707_v49 = vmul.f32 0.044715, %v3701_v47  ;;  %v3696_v50 = vadd.f32 %v4257_v45, %v3695_v48  ;;  %v3705_v1 = vmul.f32 0.5, %v3701_v47 }
 0xe4f   : > { %v3709_v51 = vmul.f32 %v3707_v49, %v3701_v47  ;;  %v3706_v52 = vmul.f32 0.044715, %v3696_v50  ;;  %v3704_v63 = vmul.f32 0.5, %v3696_v50 }
 0xe51   : > { %v3711_v53 = vmul.f32 %v3709_v51, %v3701_v47  ;;  %v3708_v54 = vmul.f32 %v3706_v52, %v3696_v50 }
 0xe53   : > { %v3713_v55 = vadd.f32 %v3711_v53, %v3701_v47  ;;  %v3710_v56 = vmul.f32 %v3708_v54, %v3696_v50 }
 0xe55   : > { %v3712_v57 = vadd.f32 %v3710_v56, %v3696_v50  ;;  %v3715_v59 = vmul.f32 0.7978846, %v3713_v55 }
 0xe57   : > { %v3714_v61 = vmul.f32 0.7978846, %v3712_v57  ;;  %4720 = vtanh.f32 %v3715_v59 }
 0xe59   : > { %4722 = vtanh.f32 %v3714_v61 }
 0xe64   : > { %v4721_v14 = vpop.eup %4720 }
 0xe65   : > { %v3719_v40 = vadd.f32 1.0, %v4721_v14 }
 0xe66   : > { %v4723_v62 = vpop.eup %4722 }
 0xe67   : > { %v3718_v0 = vadd.f32 1.0, %v4723_v62  ;;  %v3721_v2 = vmul.f32 %v3719_v40, %v3705_v1 }
 0xe69   : > { %v3720_v39 = vmul.f32 %v3718_v0, %v3704_v63 }
 0xe6b   : > { %4598 = vmatprep.mubr.f32.mxu0 %v3720_v39 }
 0xe6c   : > { %4599 = vmatmul.mubr.f32.vlgmr.msra.gmra.mxu0 %v3721_v2 }
 0xf2c   : > { %v4600_v3 = vpop.f32.mrf.mxu0 }
 0xf2d   : > { %v3814_v5 = vadd.f32 %v4600_v3, %v5292_v58 }
 0xf2e   : > { %v3804_v6 = vpop.f32.mrf.mxu0 }
 0xf2f   : > { %v3823_v7 = vadd.f32 %v4260_v4, %v3814_v5  ;;  %v3813_v8 = vadd.f32 %v3804_v6, %v5295_v60  ;;  %3829 = sbr.rel (%p4261_p5) target bundleno = 4133 (0x1025), region = 152 }
 0xf31   : > { %3825 = vst.msk [vmem:[#allocation2 + $0x8] sm:$0xff] %vm1785_vm14, %v3823_v7  ;;  %v3822_v10 = vadd.f32 %v4260_v4, %v3813_v8 }
 0xf33   : > { %3824 = vst.msk [vmem:[#allocation2] sm:$0xff] %vm1785_vm14, %v3822_v10 }
 0xf34   : > { %v3833_v11 = vld [vmem:[%s5432_s2 + $0x18] sm:$0xff]  ;;  %v3832_v12 = vld [vmem:[%s5432_s2 + $0x10] sm:$0xff]  ;;  %4609 = vmatprep.mubr.msk.f32.mxu0 %vm1785_vm14, %v3822_v10  ;;  %v3831_v58 = vld [vmem:[%s5432_s2 + $0x8] sm:$0xff] }
 0xf35   : > { %4601 = vmatprep.subr.mxu0 %v3833_v11  ;;  %v3830_v60 = vld [vmem:[%s5432_s2] sm:$0xff] }
 0xf36   : > { %4602 = vmatpush3.msra.mxu0 %v3833_v11  ;;  %v4262_v15 = vld [vmem:[%s5433_s0] ss:$0 sm:$0xff] }
 0xf37   : > { %4603 = vmatprep.subr.mxu0 %v3832_v12 }
 0xf38   : > { %4604 = vmatpush3.msra.mxu0 %v3832_v12 }
 0xf39   : > { %4605 = vmatprep.subr.mxu0 %v3831_v58 }
 0xf3a   : > { %4606 = vmatpush3.msra.mxu0 %v3831_v58 }
 0xf3b   : > { %4607 = vmatprep.subr.mxu0 %v3830_v60 }
 0xf3c   : > { %4608 = vmatpush3.msra.mxu0 %v3830_v60 }
 0xf3d   : > { %4610 = vmatmul.mubr.msk.f32.vlgmr.msra.gmra.mxu0 %vm1785_vm14, %v3823_v7 }
 0xffd   : > { %v4611_v16 = vpop.f32.mrf.mxu0 }
 0xffe   : > { %v3919_v17 = vadd.f32 %v4611_v16, %v4262_v15 }
 0xfff   : > { %v3913_v18 = vpop.f32.mrf.mxu0 }
0x1000   : > { %v3923_v19 = vsub.f32 0.0, %v3919_v17  ;;  %v3914_v20 = vadd.f32 %v4262_v15, %v3913_v18 }
0x1002   : > { %v3926_v21 = vmul.f32 1.442695, %v3923_v19  ;;  %v3922_v22 = vsub.f32 0.0, %v3914_v20 }
0x1004   : > { %4724 = vpow2.f32 %v3926_v21  ;;  %v3924_v23 = vmul.f32 1.442695, %v3922_v22 }
0x1006   : > { %4726 = vpow2.f32 %v3924_v23 }
0x1011   : > { %v4725_v24 = vpop.eup %4724 }
0x1012   : > { %v3929_v25 = vadd.f32 1.0, %v4725_v24 }
0x1013   : > { %v4727_v26 = vpop.eup %4726 }
0x1014   : > { %4728 = vrcp.f32 %v3929_v25  ;;  %v3928_v27 = vadd.f32 1.0, %v4727_v26 }
0x1016   : > { %4730 = vrcp.f32 %v3928_v27 }
0x1021   : > { %v4729_v28 = vpop.eup %4728 }
0x1022   : > { %3933 = vst.msk [vmem:[#allocation5 + $0x8] sm:$0xff] %vm2786_vm3, %v4729_v28 }
0x1023   : > { %v4731_v9 = vpop.eup %4730 }
0x1024   : > { %3932 = vst.msk [vmem:[#allocation5] sm:$0xff] %vm2786_vm3, %v4731_v9 }
0x1025 PF: > { %s5434_s10 = sld [smem:[#allocation29_spill]]  ;;  %s4820_s26 = smov [#allocation5]  }
0x1026   : > { %s3940_s18 = sshll.u32 %s4820_s26, 4  ;;  %s3941_s18 = int_to_ptr.vmem [resolvable:$true] %s3940_s18 }
0x1027   : > { %s4732_s16 = scalar_lea.vmem %s3941_s18, 256  ;;  %p4739_p10 = scmp.lt.s32.totalorder %s3941_s18, %s3941_s18 }
0x1028   : > { %p4733_p7 = scmp.ne.s32.totalorder %s3941_s18, %s4732_s16  ;;  %p4740_p11 = scmp.lt.s32.totalorder %s4732_s16, %s4732_s16 }
0x102a   : > { %p4741_p12 = por %p4740_p11, %p4739_p10 }
0x102b   : > { %p4616_p6 = scmp.eq.s32.totalorder %s5434_s10, 1 }
0x102d   : > { %p4734_p8 = pnand %p4733_p7, %p4616_p6 }
0x102f   : > { %p4735_p9 = pneg %p4734_p8 }
0x1031   : > { %p4742_p13 = pnand %p4741_p12, %p4735_p9 }
0x1033   : > { %4745 = shalt.err (!%p4742_p13)
}
0x1034   : > { %s4821_s22 = smov 128   ;;  %s5435_s28 = sld [smem:[#allocation27_spill]] }
0x103a   : > { %4613 = dma.vmem_to_hbm [thread:$0]  (%p4616_p6), %s3941_s18, 256, %s5435_s28, [#allocation6], %s4821_s22, %s4821_s22, %s4817_s12  }
0x103b   : > { %4761 = dma.done.wait (%p4616_p6), [#allocation6], 256  }
0x103c   : > { %4763 = vsyncadd (%p4616_p6), [#allocation6], 4294967040 }
0x103d PF: > { %s5436_s7 = sld [smem:[#allocation28_spill]] }
0x1043   : > { %s74_s22 = sadd.s32 1, %s5436_s7  }
0x1044   : > { %p71_p0 = scmp.ge.s32.totalorder %s74_s22, 4  }
0x1046   :  { %73 = sbr.rel (!%p71_p0) target bundleno = 61 (0x3d), region = 261 }
0x104b   :  { %3956 = vsyncpa [#allocation6], 1 }
0x104c   :  { %3958 = vsyncpa [#allocation6 + $0x1], 1 }

</bundles_post_ra>
